<compile_context>
chip_gen: v5e
topology: v5e:2x2
jax: 0.10.0
libtpu: 0.0.40
codegen_flags: <defaults>
</compile_context>

<pallas_src>
import functools

import jax
import jax.numpy as jnp
from jax.experimental import pallas as pl
from jax.experimental.pallas import tpu as pltpu

MASK_RES = 28   # raw mask resolution produced by the mask head
FEAT_RES = 14   # mask-head feature resolution
FEAT_CH = 256   # mask-head feature channels  (concat output has 257 channels)


# ---------------------------------------------------------------------------
# F.interpolate(raw_masks, (14,14), 'nearest') + torch.cat((raw_small, feat), dim=1)
# Nearest downsample at exact scale 2 == raw[..., ::2, ::2]; the concat is a pure copy.
# Per the performance review this is handled by XLA (fused lane-dense copy) rather than
# a dedicated Pallas kernel.
# ---------------------------------------------------------------------------
def feat_mask_concat(raw_masks, feat_masks):
    """raw (..., 1, 28, 28), feat (..., 256, 14, 14) -> (..., 257, 14, 14)."""
    raw_small = raw_masks[..., ::2, ::2].astype(jnp.float32)
    return jnp.concatenate([raw_small, feat_masks.astype(jnp.float32)], axis=-3)


# ---------------------------------------------------------------------------
# Kernel 1: paste_mask_in_image for every instance + background = min_n(1 - pasted)
#   raw   : (B, N, 28, 28)   box table : (B*N*6,) int32 in SMEM (scalar prefetch)
#   out   : pasted (B, N, H, W) , background (B, 1, H, W)
# One grid step handles ALL N instances of one batch element.  Nearest-resize-into-box is
# expressed as  Rsel @ mask @ Csel  with data-dependent one-hot selection matrices built
# from iotas (MXU path); the iotas are hoisted out of the instance loop, the background
# running min lives in registers and is written exactly once.
# TODO(synk): for real image sizes, tile H into a grid axis (block (1,1,TH,W)) to bound
# the pasted/back double buffers within v7x's 64 MiB VMEM.
# ---------------------------------------------------------------------------
def _paste_kernel(tbl_ref, raw_ref, pasted_ref, back_ref, *, H, W, N):
    b = pl.program_id(0)

    # Constant iotas: built once per batch element (not once per instance).
    Yi = jax.lax.broadcasted_iota(jnp.int32, (H, MASK_RES), 0).astype(jnp.float32)
    Ri = jax.lax.broadcasted_iota(jnp.int32, (H, MASK_RES), 1).astype(jnp.float32)
    Ci = jax.lax.broadcasted_iota(jnp.int32, (MASK_RES, W), 0).astype(jnp.float32)
    Xi = jax.lax.broadcasted_iota(jnp.int32, (MASK_RES, W), 1).astype(jnp.float32)

    back = None
    for n in range(N):                               # static unroll over instances
        base = (b * N + n) * 6
        x0 = tbl_ref[base + 0].astype(jnp.float32)
        y0 = tbl_ref[base + 1].astype(jnp.float32)
        x1 = tbl_ref[base + 2].astype(jnp.float32)
        y1 = tbl_ref[base + 3].astype(jnp.float32)
        mw = tbl_ref[base + 4].astype(jnp.float32)   # clamped >= 1 in the wrapper
        mh = tbl_ref[base + 5].astype(jnp.float32)   # clamped >= 1 in the wrapper

        in_row = (Yi >= y0) & (Yi < y1)
        src_row = jnp.floor((Yi - y0) * float(MASK_RES) / mh)
        Rsel = jnp.where(in_row & (src_row == Ri), 1.0, 0.0)        # (H, 28)

        in_col = (Xi >= x0) & (Xi < x1)
        src_col = jnp.floor((Xi - x0) * float(MASK_RES) / mw)
        Csel = jnp.where(in_col & (src_col == Ci), 1.0, 0.0)        # (28, W)

        m = raw_ref[0, n]                                           # (28, 28)
        pasted = jnp.dot(jnp.dot(Rsel, m, preferred_element_type=jnp.float32),
                         Csel, preferred_element_type=jnp.float32)  # (H, W)
        pasted_ref[0, n] = pasted

        inv = 1.0 - pasted
        back = inv if back is None else jnp.minimum(back, inv)

    back_ref[0, 0] = back


def paste_masks_and_background(raw_masks, boxes, H, W):
    """raw (B,N,28,28), boxes (B,N,4) -> pasted (B,N,H,W), background (B,1,H,W)."""
    B, N = raw_masks.shape[:2]
    boxes = boxes.astype(jnp.float32)
    # mask_box = max(ceil(box) - 1, 0)  — matches torch paste_mask_in_image, where this
    # box math happens on CPU/numpy before the paste.  Widths clamped >= 1 to avoid the
    # Inf/NaN of a degenerate box (review correctness note).
    mb = jnp.maximum(jnp.ceil(boxes) - 1.0, 0.0)
    x0, y0, x1, y1 = mb[..., 0], mb[..., 1], mb[..., 2], mb[..., 3]
    mw = jnp.maximum(x1 - x0, 1.0)
    mh = jnp.maximum(y1 - y0, 1.0)
    box_tbl = jnp.stack([x0, y0, x1, y1, mw, mh], axis=-1)          # (B, N, 6), integral
    box_tbl = box_tbl.astype(jnp.int32).reshape(-1)                 # (B*N*6,) for SMEM

    grid_spec = pltpu.PrefetchScalarGridSpec(
        num_scalar_prefetch=1,
        grid=(B,),
        in_specs=[
            pl.BlockSpec((1, N, MASK_RES, MASK_RES), lambda b, tbl: (b, 0, 0, 0)),
        ],
        out_specs=(
            pl.BlockSpec((1, N, H, W), lambda b, tbl: (b, 0, 0, 0)),
            pl.BlockSpec((1, 1, H, W), lambda b, tbl: (b, 0, 0, 0)),
        ),
    )
    return pl.pallas_call(
        functools.partial(_paste_kernel, H=H, W=W, N=N),
        out_shape=(jax.ShapeDtypeStruct((B, N, H, W), jnp.float32),
                   jax.ShapeDtypeStruct((B, 1, H, W), jnp.float32)),
        grid_spec=grid_spec,
        compiler_params=pltpu.CompilerParams(
            dimension_semantics=("parallel",)),      # B shards across v7x's 2 TCs
    )(box_tbl, raw_masks.astype(jnp.float32))


# ---------------------------------------------------------------------------
# Kernel 2: convert_to_shapestack_format — elementwise bbox transform on (M, 4).
# Context + target boxes are merged into one call; the result is assembled in-register
# with iota selects and written with a SINGLE full-block store (no 1-lane column writes).
# ---------------------------------------------------------------------------
def _shapestack_kernel(b_ref, out_ref, *, H, W):
    Wf, Hf = float(W), float(H)
    bx = b_ref[...]                                  # (M, 4)
    x1 = bx[:, 0:1] * Wf
    y1 = bx[:, 1:2] * Hf
    x2 = bx[:, 2:3] * Wf
    y2 = bx[:, 3:4] * Hf
    x2 = jnp.where(x2 >= Wf, Wf - 1.0, x2)
    y2 = jnp.where(y2 >= Hf, Hf - 1.0, y2)
    x1 = jnp.where(x1 < 0.0, 0.0, x1)
    y1 = jnp.where(y1 < 0.0, 0.0, y1)
    bw = x2 - x1
    bh = y2 - y1
    cx = (x1 + 0.5 * bw) * (1.0 / Wf)
    cy = (y1 + 0.5 * bh) * (1.0 / Hf)
    col = jax.lax.broadcasted_iota(jnp.int32, bx.shape, 1)
    out = (jnp.where(col == 0, cx, 0.0)
           + jnp.where(col == 1, cy, 0.0)
           + jnp.where(col == 2, bw * (1.0 / Wf), 0.0)
           + jnp.where(col == 3, bh * (1.0 / Hf), 0.0))
    out_ref[...] = out


def convert_to_shapestack_format(norm_bboxes, H, W):
    shape = norm_bboxes.shape
    flat = norm_bboxes.reshape(-1, 4).astype(jnp.float32)
    out = pl.pallas_call(
        functools.partial(_shapestack_kernel, H=H, W=W),
        out_shape=jax.ShapeDtypeStruct(flat.shape, jnp.float32),
    )(flat)
    return out.reshape(shape)


# ---------------------------------------------------------------------------
# Glue: deterministic synthetic stand-in for the detectron2 Mask R-CNN predictions.
# TODO(synk): the pretrained InstanceSegmentation / OpticalFlow backbones cannot be
# translated; predictions are synthesized deterministically instead.
# ---------------------------------------------------------------------------
def synthetic_instance_predictions(frames, key, num_instances):
    B, T, C, H, W = frames.shape
    N = num_instances
    k1, k2, k3, k4, k5, k6 = jax.random.split(key, 6)
    x0 = jax.random.uniform(k1, (B, T, N, 1), minval=0.0, maxval=W - 12.0)
    y0 = jax.random.uniform(k2, (B, T, N, 1), minval=0.0, maxval=H - 12.0)
    wh = jax.random.uniform(k3, (B, T, N, 2), minval=6.0, maxval=10.0)
    bboxes = jnp.concatenate([x0, y0, x0 + wh[..., 0:1], y0 + wh[..., 1:2]], axis=-1)
    scale = jnp.array([W, H, W, H], jnp.float32)
    norm_bboxes = bboxes / scale
    raw_masks = jax.random.uniform(k4, (B, T, N, 1, MASK_RES, MASK_RES))
    feat_masks = jax.random.normal(k5, (B, T, N, FEAT_CH, FEAT_RES, FEAT_RES))
    frame_mean = jnp.mean(frames, axis=(2, 3, 4))                         # (B, T)
    feat_masks = feat_masks * (1.0 + frame_mean[:, :, None, None, None, None])
    binary_masks = jax.random.bernoulli(k6, 0.3, (B, T, N, H, W)).astype(jnp.float32)
    pred_classes = jnp.zeros((B, T, N), jnp.int32)
    return dict(feat_masks=feat_masks, binary_masks=binary_masks,
                norm_bboxes=norm_bboxes, bboxes=bboxes,
                raw_masks=raw_masks, pred_classes=pred_classes)


def _centroids(boxes):
    x1, y1, x2, y2 = boxes[:, 0], boxes[:, 1], boxes[:, 2], boxes[:, 3]
    return jnp.stack([x1 + (x2 - x1) / 2, y1 + (y2 - y1) / 2], axis=1)


def _pairwise_dist(a, b):
    d = a[:, None, :] - b[None, :, :]
    return jnp.sqrt(jnp.sum(d * d, axis=-1))


# ---------------------------------------------------------------------------
# Forward pass (InstanceSegmenter.forward, inference path: enable_seg_losses=False)
# ---------------------------------------------------------------------------
def instance_segmenter_forward(batch, *, num_instances=4):
    context = batch['context_frames']          # (B, Tc, C, H, W)
    target = batch['target_frames']            # (B, Ts, C, H, W)
    B, Tc, C, H, W = context.shape
    Ts = target.shape[1]
    N = num_instances

    flow_bboxes = None                          # TODO(synk): OpticalFlow not translatable
    rcnn_losses = {}                            # TODO(synk): Mask R-CNN training losses skipped

    ctx_pred = synthetic_instance_predictions(context, jax.random.PRNGKey(1), N)
    tgt_pred = synthetic_instance_predictions(target, jax.random.PRNGKey(2), N)

    # --- nearest downsample + channel concat of mask features (XLA fused copy) ---
    ctx_featraw = feat_mask_concat(ctx_pred['raw_masks'], ctx_pred['feat_masks'])
    tgt_featraw = feat_mask_concat(tgt_pred['raw_masks'], tgt_pred['feat_masks'])
    # shapes: (B, Tc, N, 257, 14, 14) / (B, Ts, N, 257, 14, 14)

    # --- paste masks of last context frame + background min-reduction (Pallas) ---
    last_raw = ctx_pred['raw_masks'][:, Tc - 1, :, 0]     # (B, N, 28, 28)
    last_boxes = ctx_pred['bboxes'][:, Tc - 1]            # (B, N, 4)
    pasted, background_masks = paste_masks_and_background(last_raw, last_boxes, H, W)
    context_foreground_masks = [pasted[b][:, None] for b in range(B)]          # (N,1,H,W)
    context_foreground_binary_masks = [ctx_pred['binary_masks'][b, Tc - 1][:, None]
                                       for b in range(B)]

    # --- target association by nearest centroid (tiny (N,4) bookkeeping: JAX glue) ---
    target_feat_masks, target_norm_bboxes, target_bboxes_img, gt_masks = [], [], [], []
    for b in range(B):
        current_boxes = ctx_pred['bboxes'][b, 0]
        seq_feat, seq_norm, seq_box, seq_gt = [], [], [], []
        for t in range(Ts):
            pred_boxes = tgt_pred['bboxes'][b, t]
            d = _pairwise_dist(_centroids(pred_boxes), _centroids(current_boxes))
            min_inds = jnp.argmin(d, axis=0)
            current_boxes = jnp.take(pred_boxes, min_inds, axis=0)
            seq_box.append(current_boxes)
            seq_gt.append(jnp.take(tgt_pred['binary_masks'][b, t], min_inds, axis=0))
            seq_feat.append(jnp.take(tgt_featraw[b, t], min_inds, axis=0))
            seq_norm.append(jnp.take(tgt_pred['norm_bboxes'][b, t], min_inds, axis=0))
        target_feat_masks.append(jnp.stack(seq_feat))      # (Ts, N, 257, 14, 14)
        target_norm_bboxes.append(jnp.stack(seq_norm))     # (Ts, N, 4)
        target_bboxes_img.append(jnp.stack(seq_box))       # (Ts, N, 4)
        gt_masks.append(jnp.stack(seq_gt))                 # (Ts, N, H, W)
    target_norm_bboxes = jnp.stack(target_norm_bboxes)     # (B, Ts, N, 4)

    # --- shapestack-format bbox conversion (Pallas, single merged call) ---
    n_ctx = B * Tc * N
    all_norm = jnp.concatenate([ctx_pred['norm_bboxes'].reshape(-1, 4),
                                target_norm_bboxes.reshape(-1, 4)], axis=0)
    all_ss = convert_to_shapestack_format(all_norm, H, W)
    context_norm_ss = all_ss[:n_ctx].reshape(B, Tc, N, 4)
    target_norm_ss = all_ss[n_ctx:].reshape(B, Ts, N, 4)

    # TODO(synk): GraphConstructorSegmenter not translatable; return its input tensors.
    graph_info = (ctx_featraw, context_norm_ss,
                  jnp.stack(target_feat_masks), target_norm_ss)
    visual_info = (ctx_pred['bboxes'], jnp.stack(target_bboxes_img),
                   context_foreground_masks, context_foreground_binary_masks,
                   flow_bboxes)
    return graph_info, background_masks, rcnn_losses, jnp.stack(gt_masks), visual_info


if __name__ == "__main__":
    key = jax.random.PRNGKey(0)
    kc, kt = jax.random.split(key)
    B, Tc, Ts, C, H, W = 2, 2, 2, 3, 32, 32
    batch = {
        'context_frames': jax.random.uniform(kc, (B, Tc, C, H, W), jnp.float32),
        'target_frames': jax.random.uniform(kt, (B, Ts, C, H, W), jnp.float32),
    }
    graph_info, background_masks, rcnn_losses, gt_masks, visual_info = \
        instance_segmenter_forward(batch, num_instances=4)
    jax.block_until_ready((graph_info, background_masks, gt_masks))
    print("KERNEL_OK")
</pallas_src>

<mosaic_0001>
module attributes {stable_mosaic.version = 11 : i64} {
  func.func @_paste_kernel(%arg0: i32, %arg1: memref<48xi32, #tpu.memory_space<smem>>, %arg2: memref<1x4x28x28xf32, #tpu.memory_space<vmem>>, %arg3: memref<1x4x32x32xf32, #tpu.memory_space<vmem>>, %arg4: memref<1x1x32x32xf32, #tpu.memory_space<vmem>>) attributes {dimension_semantics = [#tpu.dimension_semantics<parallel>], iteration_bounds = array<i64: 2>, scalar_prefetch = 1 : i64, scratch_operands = 0 : i64, tpu.core_type = #tpu.core_type<tc>, window_params = [{transform_indices = @transform_0, window_bounds = array<i64: 1, 4, 28, 28>}, {transform_indices = @transform_1, window_bounds = array<i64: 1, 4, 32, 32>}, {transform_indices = @transform_2, window_bounds = array<i64: 1, 1, 32, 32>}]} {
    %0 = tpu.iota {dimensions = array<i32: 0>} : vector<32x28xi32>
    %1 = arith.sitofp %0 : vector<32x28xi32> to vector<32x28xf32>
    %2 = tpu.iota {dimensions = array<i32: 1>} : vector<32x28xi32>
    %3 = arith.sitofp %2 : vector<32x28xi32> to vector<32x28xf32>
    %4 = tpu.iota {dimensions = array<i32: 0>} : vector<28x32xi32>
    %5 = arith.sitofp %4 : vector<28x32xi32> to vector<28x32xf32>
    %6 = tpu.iota {dimensions = array<i32: 1>} : vector<28x32xi32>
    %7 = arith.sitofp %6 : vector<28x32xi32> to vector<28x32xf32>
    %c4_i32 = arith.constant 4 : i32
    %8 = arith.muli %arg0, %c4_i32 : i32
    %c0_i32 = arith.constant 0 : i32
    %9 = arith.addi %8, %c0_i32 : i32
    %c6_i32 = arith.constant 6 : i32
    %10 = arith.muli %9, %c6_i32 : i32
    %c0_i32_0 = arith.constant 0 : i32
    %11 = arith.addi %10, %c0_i32_0 : i32
    %12 = arith.index_cast %11 : i32 to index
    %13 = memref.load %arg1[%12] : memref<48xi32, #tpu.memory_space<smem>>
    %14 = arith.sitofp %13 : i32 to f32
    %c1_i32 = arith.constant 1 : i32
    %15 = arith.addi %10, %c1_i32 : i32
    %16 = arith.index_cast %15 : i32 to index
    %17 = memref.load %arg1[%16] : memref<48xi32, #tpu.memory_space<smem>>
    %18 = arith.sitofp %17 : i32 to f32
    %c2_i32 = arith.constant 2 : i32
    %19 = arith.addi %10, %c2_i32 : i32
    %20 = arith.index_cast %19 : i32 to index
    %21 = memref.load %arg1[%20] : memref<48xi32, #tpu.memory_space<smem>>
    %22 = arith.sitofp %21 : i32 to f32
    %c3_i32 = arith.constant 3 : i32
    %23 = arith.addi %10, %c3_i32 : i32
    %24 = arith.index_cast %23 : i32 to index
    %25 = memref.load %arg1[%24] : memref<48xi32, #tpu.memory_space<smem>>
    %26 = arith.sitofp %25 : i32 to f32
    %c4_i32_1 = arith.constant 4 : i32
    %27 = arith.addi %10, %c4_i32_1 : i32
    %28 = arith.index_cast %27 : i32 to index
    %29 = memref.load %arg1[%28] : memref<48xi32, #tpu.memory_space<smem>>
    %30 = arith.sitofp %29 : i32 to f32
    %c5_i32 = arith.constant 5 : i32
    %31 = arith.addi %10, %c5_i32 : i32
    %32 = arith.index_cast %31 : i32 to index
    %33 = memref.load %arg1[%32] : memref<48xi32, #tpu.memory_space<smem>>
    %34 = arith.sitofp %33 : i32 to f32
    %35 = vector.broadcast %18 : f32 to vector<32x28xf32>
    %36 = arith.cmpf oge, %1, %35 : vector<32x28xf32>
    %37 = vector.broadcast %26 : f32 to vector<32x28xf32>
    %38 = arith.cmpf olt, %1, %37 : vector<32x28xf32>
    %39 = arith.andi %36, %38 : vector<32x28xi1>
    %40 = vector.broadcast %18 : f32 to vector<32x28xf32>
    %41 = arith.subf %1, %40 : vector<32x28xf32>
    %cst = arith.constant 2.800000e+01 : f32
    %42 = vector.broadcast %cst : f32 to vector<32x28xf32>
    %43 = arith.mulf %41, %42 : vector<32x28xf32>
    %44 = vector.broadcast %34 : f32 to vector<32x28xf32>
    %45 = arith.divf %43, %44 : vector<32x28xf32>
    %46 = math.floor %45 : vector<32x28xf32>
    %47 = arith.cmpf oeq, %46, %3 : vector<32x28xf32>
    %48 = arith.andi %39, %47 : vector<32x28xi1>
    %cst_2 = arith.constant 1.000000e+00 : f32
    %cst_3 = arith.constant 0.000000e+00 : f32
    %49 = vector.broadcast %cst_2 : f32 to vector<32x28xf32>
    %50 = vector.broadcast %cst_3 : f32 to vector<32x28xf32>
    %51 = arith.select %48, %49, %50 : vector<32x28xi1>, vector<32x28xf32>
    %52 = vector.broadcast %14 : f32 to vector<28x32xf32>
    %53 = arith.cmpf oge, %7, %52 : vector<28x32xf32>
    %54 = vector.broadcast %22 : f32 to vector<28x32xf32>
    %55 = arith.cmpf olt, %7, %54 : vector<28x32xf32>
    %56 = arith.andi %53, %55 : vector<28x32xi1>
    %57 = vector.broadcast %14 : f32 to vector<28x32xf32>
    %58 = arith.subf %7, %57 : vector<28x32xf32>
    %cst_4 = arith.constant 2.800000e+01 : f32
    %59 = vector.broadcast %cst_4 : f32 to vector<28x32xf32>
    %60 = arith.mulf %58, %59 : vector<28x32xf32>
    %61 = vector.broadcast %30 : f32 to vector<28x32xf32>
    %62 = arith.divf %60, %61 : vector<28x32xf32>
    %63 = math.floor %62 : vector<28x32xf32>
    %64 = arith.cmpf oeq, %63, %5 : vector<28x32xf32>
    %65 = arith.andi %56, %64 : vector<28x32xi1>
    %cst_5 = arith.constant 1.000000e+00 : f32
    %cst_6 = arith.constant 0.000000e+00 : f32
    %66 = vector.broadcast %cst_5 : f32 to vector<28x32xf32>
    %67 = vector.broadcast %cst_6 : f32 to vector<28x32xf32>
    %68 = arith.select %65, %66, %67 : vector<28x32xi1>, vector<28x32xf32>
    %c0 = arith.constant 0 : index
    %c0_7 = arith.constant 0 : index
    %c0_8 = arith.constant 0 : index
    %c0_9 = arith.constant 0 : index
    %69 = vector.load %arg2[%c0, %c0_7, %c0_8, %c0_9] : memref<1x4x28x28xf32, #tpu.memory_space<vmem>>, vector<1x1x28x28xf32>
    %70 = vector.shape_cast %69 : vector<1x1x28x28xf32> to vector<28x28xf32>
    %cst_10 = arith.constant dense<0.000000e+00> : vector<32x28xf32>
    %71 = tpu.matmul %51, %70, %cst_10 {dimension_numbers = #tpu.dot_dimension_numbers<[1], [0], [0], [1], [0, 0, 1, 1], [], []>} : vector<32x28xf32>, vector<28x28xf32>, vector<32x28xf32> -> vector<32x28xf32>
    %cst_11 = arith.constant dense<0.000000e+00> : vector<32x32xf32>
    %72 = tpu.matmul %71, %68, %cst_11 {dimension_numbers = #tpu.dot_dimension_numbers<[1], [0], [0], [1], [0, 0, 1, 1], [], []>} : vector<32x28xf32>, vector<28x32xf32>, vector<32x32xf32> -> vector<32x32xf32>
    %c0_12 = arith.constant 0 : index
    %c0_13 = arith.constant 0 : index
    %c0_14 = arith.constant 0 : index
    %c0_15 = arith.constant 0 : index
    %73 = vector.load %arg3[%c0_12, %c0_13, %c0_14, %c0_15] : memref<1x4x32x32xf32, #tpu.memory_space<vmem>>, vector<1x1x32x32xf32>
    %74 = vector.shape_cast %73 : vector<1x1x32x32xf32> to vector<32x32xf32>
    %75 = vector.shape_cast %72 : vector<32x32xf32> to vector<1x1x32x32xf32>
    tpu.vector_store %arg3[%c0_12, %c0_13, %c0_14, %c0_15], %75 {strides = array<i32>} : memref<1x4x32x32xf32, #tpu.memory_space<vmem>>, vector<1x1x32x32xf32>,
    %cst_16 = arith.constant 1.000000e+00 : f32
    %76 = vector.broadcast %cst_16 : f32 to vector<32x32xf32>
    %77 = arith.subf %76, %72 : vector<32x32xf32>
    %c4_i32_17 = arith.constant 4 : i32
    %78 = arith.muli %arg0, %c4_i32_17 : i32
    %c1_i32_18 = arith.constant 1 : i32
    %79 = arith.addi %78, %c1_i32_18 : i32
    %c6_i32_19 = arith.constant 6 : i32
    %80 = arith.muli %79, %c6_i32_19 : i32
    %c0_i32_20 = arith.constant 0 : i32
    %81 = arith.addi %80, %c0_i32_20 : i32
    %82 = arith.index_cast %81 : i32 to index
    %83 = memref.load %arg1[%82] : memref<48xi32, #tpu.memory_space<smem>>
    %84 = arith.sitofp %83 : i32 to f32
    %c1_i32_21 = arith.constant 1 : i32
    %85 = arith.addi %80, %c1_i32_21 : i32
    %86 = arith.index_cast %85 : i32 to index
    %87 = memref.load %arg1[%86] : memref<48xi32, #tpu.memory_space<smem>>
    %88 = arith.sitofp %87 : i32 to f32
    %c2_i32_22 = arith.constant 2 : i32
    %89 = arith.addi %80, %c2_i32_22 : i32
    %90 = arith.index_cast %89 : i32 to index
    %91 = memref.load %arg1[%90] : memref<48xi32, #tpu.memory_space<smem>>
    %92 = arith.sitofp %91 : i32 to f32
    %c3_i32_23 = arith.constant 3 : i32
    %93 = arith.addi %80, %c3_i32_23 : i32
    %94 = arith.index_cast %93 : i32 to index
    %95 = memref.load %arg1[%94] : memref<48xi32, #tpu.memory_space<smem>>
    %96 = arith.sitofp %95 : i32 to f32
    %c4_i32_24 = arith.constant 4 : i32
    %97 = arith.addi %80, %c4_i32_24 : i32
    %98 = arith.index_cast %97 : i32 to index
    %99 = memref.load %arg1[%98] : memref<48xi32, #tpu.memory_space<smem>>
    %100 = arith.sitofp %99 : i32 to f32
    %c5_i32_25 = arith.constant 5 : i32
    %101 = arith.addi %80, %c5_i32_25 : i32
    %102 = arith.index_cast %101 : i32 to index
    %103 = memref.load %arg1[%102] : memref<48xi32, #tpu.memory_space<smem>>
    %104 = arith.sitofp %103 : i32 to f32
    %105 = vector.broadcast %88 : f32 to vector<32x28xf32>
    %106 = arith.cmpf oge, %1, %105 : vector<32x28xf32>
    %107 = vector.broadcast %96 : f32 to vector<32x28xf32>
    %108 = arith.cmpf olt, %1, %107 : vector<32x28xf32>
    %109 = arith.andi %106, %108 : vector<32x28xi1>
    %110 = vector.broadcast %88 : f32 to vector<32x28xf32>
    %111 = arith.subf %1, %110 : vector<32x28xf32>
    %cst_26 = arith.constant 2.800000e+01 : f32
    %112 = vector.broadcast %cst_26 : f32 to vector<32x28xf32>
    %113 = arith.mulf %111, %112 : vector<32x28xf32>
    %114 = vector.broadcast %104 : f32 to vector<32x28xf32>
    %115 = arith.divf %113, %114 : vector<32x28xf32>
    %116 = math.floor %115 : vector<32x28xf32>
    %117 = arith.cmpf oeq, %116, %3 : vector<32x28xf32>
    %118 = arith.andi %109, %117 : vector<32x28xi1>
    %cst_27 = arith.constant 1.000000e+00 : f32
    %cst_28 = arith.constant 0.000000e+00 : f32
    %119 = vector.broadcast %cst_27 : f32 to vector<32x28xf32>
    %120 = vector.broadcast %cst_28 : f32 to vector<32x28xf32>
    %121 = arith.select %118, %119, %120 : vector<32x28xi1>, vector<32x28xf32>
    %122 = vector.broadcast %84 : f32 to vector<28x32xf32>
    %123 = arith.cmpf oge, %7, %122 : vector<28x32xf32>
    %124 = vector.broadcast %92 : f32 to vector<28x32xf32>
    %125 = arith.cmpf olt, %7, %124 : vector<28x32xf32>
    %126 = arith.andi %123, %125 : vector<28x32xi1>
    %127 = vector.broadcast %84 : f32 to vector<28x32xf32>
    %128 = arith.subf %7, %127 : vector<28x32xf32>
    %cst_29 = arith.constant 2.800000e+01 : f32
    %129 = vector.broadcast %cst_29 : f32 to vector<28x32xf32>
    %130 = arith.mulf %128, %129 : vector<28x32xf32>
    %131 = vector.broadcast %100 : f32 to vector<28x32xf32>
    %132 = arith.divf %130, %131 : vector<28x32xf32>
    %133 = math.floor %132 : vector<28x32xf32>
    %134 = arith.cmpf oeq, %133, %5 : vector<28x32xf32>
    %135 = arith.andi %126, %134 : vector<28x32xi1>
    %cst_30 = arith.constant 1.000000e+00 : f32
    %cst_31 = arith.constant 0.000000e+00 : f32
    %136 = vector.broadcast %cst_30 : f32 to vector<28x32xf32>
    %137 = vector.broadcast %cst_31 : f32 to vector<28x32xf32>
    %138 = arith.select %135, %136, %137 : vector<28x32xi1>, vector<28x32xf32>
    %c0_32 = arith.constant 0 : index
    %c1 = arith.constant 1 : index
    %c0_33 = arith.constant 0 : index
    %c0_34 = arith.constant 0 : index
    %139 = vector.load %arg2[%c0_32, %c1, %c0_33, %c0_34] : memref<1x4x28x28xf32, #tpu.memory_space<vmem>>, vector<1x1x28x28xf32>
    %140 = vector.shape_cast %139 : vector<1x1x28x28xf32> to vector<28x28xf32>
    %cst_35 = arith.constant dense<0.000000e+00> : vector<32x28xf32>
    %141 = tpu.matmul %121, %140, %cst_35 {dimension_numbers = #tpu.dot_dimension_numbers<[1], [0], [0], [1], [0, 0, 1, 1], [], []>} : vector<32x28xf32>, vector<28x28xf32>, vector<32x28xf32> -> vector<32x28xf32>
    %cst_36 = arith.constant dense<0.000000e+00> : vector<32x32xf32>
    %142 = tpu.matmul %141, %138, %cst_36 {dimension_numbers = #tpu.dot_dimension_numbers<[1], [0], [0], [1], [0, 0, 1, 1], [], []>} : vector<32x28xf32>, vector<28x32xf32>, vector<32x32xf32> -> vector<32x32xf32>
    %c0_37 = arith.constant 0 : index
    %c1_38 = arith.constant 1 : index
    %c0_39 = arith.constant 0 : index
    %c0_40 = arith.constant 0 : index
    %143 = vector.load %arg3[%c0_37, %c1_38, %c0_39, %c0_40] : memref<1x4x32x32xf32, #tpu.memory_space<vmem>>, vector<1x1x32x32xf32>
    %144 = vector.shape_cast %143 : vector<1x1x32x32xf32> to vector<32x32xf32>
    %145 = vector.shape_cast %142 : vector<32x32xf32> to vector<1x1x32x32xf32>
    tpu.vector_store %arg3[%c0_37, %c1_38, %c0_39, %c0_40], %145 {strides = array<i32>} : memref<1x4x32x32xf32, #tpu.memory_space<vmem>>, vector<1x1x32x32xf32>,
    %cst_41 = arith.constant 1.000000e+00 : f32
    %146 = vector.broadcast %cst_41 : f32 to vector<32x32xf32>
    %147 = arith.subf %146, %142 : vector<32x32xf32>
    %148 = arith.minimumf %77, %147 : vector<32x32xf32>
    %c4_i32_42 = arith.constant 4 : i32
    %149 = arith.muli %arg0, %c4_i32_42 : i32
    %c2_i32_43 = arith.constant 2 : i32
    %150 = arith.addi %149, %c2_i32_43 : i32
    %c6_i32_44 = arith.constant 6 : i32
    %151 = arith.muli %150, %c6_i32_44 : i32
    %c0_i32_45 = arith.constant 0 : i32
    %152 = arith.addi %151, %c0_i32_45 : i32
    %153 = arith.index_cast %152 : i32 to index
    %154 = memref.load %arg1[%153] : memref<48xi32, #tpu.memory_space<smem>>
    %155 = arith.sitofp %154 : i32 to f32
    %c1_i32_46 = arith.constant 1 : i32
    %156 = arith.addi %151, %c1_i32_46 : i32
    %157 = arith.index_cast %156 : i32 to index
    %158 = memref.load %arg1[%157] : memref<48xi32, #tpu.memory_space<smem>>
    %159 = arith.sitofp %158 : i32 to f32
    %c2_i32_47 = arith.constant 2 : i32
    %160 = arith.addi %151, %c2_i32_47 : i32
    %161 = arith.index_cast %160 : i32 to index
    %162 = memref.load %arg1[%161] : memref<48xi32, #tpu.memory_space<smem>>
    %163 = arith.sitofp %162 : i32 to f32
    %c3_i32_48 = arith.constant 3 : i32
    %164 = arith.addi %151, %c3_i32_48 : i32
    %165 = arith.index_cast %164 : i32 to index
    %166 = memref.load %arg1[%165] : memref<48xi32, #tpu.memory_space<smem>>
    %167 = arith.sitofp %166 : i32 to f32
    %c4_i32_49 = arith.constant 4 : i32
    %168 = arith.addi %151, %c4_i32_49 : i32
    %169 = arith.index_cast %168 : i32 to index
    %170 = memref.load %arg1[%169] : memref<48xi32, #tpu.memory_space<smem>>
    %171 = arith.sitofp %170 : i32 to f32
    %c5_i32_50 = arith.constant 5 : i32
    %172 = arith.addi %151, %c5_i32_50 : i32
    %173 = arith.index_cast %172 : i32 to index
    %174 = memref.load %arg1[%173] : memref<48xi32, #tpu.memory_space<smem>>
    %175 = arith.sitofp %174 : i32 to f32
    %176 = vector.broadcast %159 : f32 to vector<32x28xf32>
    %177 = arith.cmpf oge, %1, %176 : vector<32x28xf32>
    %178 = vector.broadcast %167 : f32 to vector<32x28xf32>
    %179 = arith.cmpf olt, %1, %178 : vector<32x28xf32>
    %180 = arith.andi %177, %179 : vector<32x28xi1>
    %181 = vector.broadcast %159 : f32 to vector<32x28xf32>
    %182 = arith.subf %1, %181 : vector<32x28xf32>
    %cst_51 = arith.constant 2.800000e+01 : f32
    %183 = vector.broadcast %cst_51 : f32 to vector<32x28xf32>
    %184 = arith.mulf %182, %183 : vector<32x28xf32>
    %185 = vector.broadcast %175 : f32 to vector<32x28xf32>
    %186 = arith.divf %184, %185 : vector<32x28xf32>
    %187 = math.floor %186 : vector<32x28xf32>
    %188 = arith.cmpf oeq, %187, %3 : vector<32x28xf32>
    %189 = arith.andi %180, %188 : vector<32x28xi1>
    %cst_52 = arith.constant 1.000000e+00 : f32
    %cst_53 = arith.constant 0.000000e+00 : f32
    %190 = vector.broadcast %cst_52 : f32 to vector<32x28xf32>
    %191 = vector.broadcast %cst_53 : f32 to vector<32x28xf32>
    %192 = arith.select %189, %190, %191 : vector<32x28xi1>, vector<32x28xf32>
    %193 = vector.broadcast %155 : f32 to vector<28x32xf32>
    %194 = arith.cmpf oge, %7, %193 : vector<28x32xf32>
    %195 = vector.broadcast %163 : f32 to vector<28x32xf32>
    %196 = arith.cmpf olt, %7, %195 : vector<28x32xf32>
    %197 = arith.andi %194, %196 : vector<28x32xi1>
    %198 = vector.broadcast %155 : f32 to vector<28x32xf32>
    %199 = arith.subf %7, %198 : vector<28x32xf32>
    %cst_54 = arith.constant 2.800000e+01 : f32
    %200 = vector.broadcast %cst_54 : f32 to vector<28x32xf32>
    %201 = arith.mulf %199, %200 : vector<28x32xf32>
    %202 = vector.broadcast %171 : f32 to vector<28x32xf32>
    %203 = arith.divf %201, %202 : vector<28x32xf32>
    %204 = math.floor %203 : vector<28x32xf32>
    %205 = arith.cmpf oeq, %204, %5 : vector<28x32xf32>
    %206 = arith.andi %197, %205 : vector<28x32xi1>
    %cst_55 = arith.constant 1.000000e+00 : f32
    %cst_56 = arith.constant 0.000000e+00 : f32
    %207 = vector.broadcast %cst_55 : f32 to vector<28x32xf32>
    %208 = vector.broadcast %cst_56 : f32 to vector<28x32xf32>
    %209 = arith.select %206, %207, %208 : vector<28x32xi1>, vector<28x32xf32>
    %c0_57 = arith.constant 0 : index
    %c2 = arith.constant 2 : index
    %c0_58 = arith.constant 0 : index
    %c0_59 = arith.constant 0 : index
    %210 = vector.load %arg2[%c0_57, %c2, %c0_58, %c0_59] : memref<1x4x28x28xf32, #tpu.memory_space<vmem>>, vector<1x1x28x28xf32>
    %211 = vector.shape_cast %210 : vector<1x1x28x28xf32> to vector<28x28xf32>
    %cst_60 = arith.constant dense<0.000000e+00> : vector<32x28xf32>
    %212 = tpu.matmul %192, %211, %cst_60 {dimension_numbers = #tpu.dot_dimension_numbers<[1], [0], [0], [1], [0, 0, 1, 1], [], []>} : vector<32x28xf32>, vector<28x28xf32>, vector<32x28xf32> -> vector<32x28xf32>
    %cst_61 = arith.constant dense<0.000000e+00> : vector<32x32xf32>
    %213 = tpu.matmul %212, %209, %cst_61 {dimension_numbers = #tpu.dot_dimension_numbers<[1], [0], [0], [1], [0, 0, 1, 1], [], []>} : vector<32x28xf32>, vector<28x32xf32>, vector<32x32xf32> -> vector<32x32xf32>
    %c0_62 = arith.constant 0 : index
    %c2_63 = arith.constant 2 : index
    %c0_64 = arith.constant 0 : index
    %c0_65 = arith.constant 0 : index
    %214 = vector.load %arg3[%c0_62, %c2_63, %c0_64, %c0_65] : memref<1x4x32x32xf32, #tpu.memory_space<vmem>>, vector<1x1x32x32xf32>
    %215 = vector.shape_cast %214 : vector<1x1x32x32xf32> to vector<32x32xf32>
    %216 = vector.shape_cast %213 : vector<32x32xf32> to vector<1x1x32x32xf32>
    tpu.vector_store %arg3[%c0_62, %c2_63, %c0_64, %c0_65], %216 {strides = array<i32>} : memref<1x4x32x32xf32, #tpu.memory_space<vmem>>, vector<1x1x32x32xf32>,
    %cst_66 = arith.constant 1.000000e+00 : f32
    %217 = vector.broadcast %cst_66 : f32 to vector<32x32xf32>
    %218 = arith.subf %217, %213 : vector<32x32xf32>
    %219 = arith.minimumf %148, %218 : vector<32x32xf32>
    %c4_i32_67 = arith.constant 4 : i32
    %220 = arith.muli %arg0, %c4_i32_67 : i32
    %c3_i32_68 = arith.constant 3 : i32
    %221 = arith.addi %220, %c3_i32_68 : i32
    %c6_i32_69 = arith.constant 6 : i32
    %222 = arith.muli %221, %c6_i32_69 : i32
    %c0_i32_70 = arith.constant 0 : i32
    %223 = arith.addi %222, %c0_i32_70 : i32
    %224 = arith.index_cast %223 : i32 to index
    %225 = memref.load %arg1[%224] : memref<48xi32, #tpu.memory_space<smem>>
    %226 = arith.sitofp %225 : i32 to f32
    %c1_i32_71 = arith.constant 1 : i32
    %227 = arith.addi %222, %c1_i32_71 : i32
    %228 = arith.index_cast %227 : i32 to index
    %229 = memref.load %arg1[%228] : memref<48xi32, #tpu.memory_space<smem>>
    %230 = arith.sitofp %229 : i32 to f32
    %c2_i32_72 = arith.constant 2 : i32
    %231 = arith.addi %222, %c2_i32_72 : i32
    %232 = arith.index_cast %231 : i32 to index
    %233 = memref.load %arg1[%232] : memref<48xi32, #tpu.memory_space<smem>>
    %234 = arith.sitofp %233 : i32 to f32
    %c3_i32_73 = arith.constant 3 : i32
    %235 = arith.addi %222, %c3_i32_73 : i32
    %236 = arith.index_cast %235 : i32 to index
    %237 = memref.load %arg1[%236] : memref<48xi32, #tpu.memory_space<smem>>
    %238 = arith.sitofp %237 : i32 to f32
    %c4_i32_74 = arith.constant 4 : i32
    %239 = arith.addi %222, %c4_i32_74 : i32
    %240 = arith.index_cast %239 : i32 to index
    %241 = memref.load %arg1[%240] : memref<48xi32, #tpu.memory_space<smem>>
    %242 = arith.sitofp %241 : i32 to f32
    %c5_i32_75 = arith.constant 5 : i32
    %243 = arith.addi %222, %c5_i32_75 : i32
    %244 = arith.index_cast %243 : i32 to index
    %245 = memref.load %arg1[%244] : memref<48xi32, #tpu.memory_space<smem>>
    %246 = arith.sitofp %245 : i32 to f32
    %247 = vector.broadcast %230 : f32 to vector<32x28xf32>
    %248 = arith.cmpf oge, %1, %247 : vector<32x28xf32>
    %249 = vector.broadcast %238 : f32 to vector<32x28xf32>
    %250 = arith.cmpf olt, %1, %249 : vector<32x28xf32>
    %251 = arith.andi %248, %250 : vector<32x28xi1>
    %252 = vector.broadcast %230 : f32 to vector<32x28xf32>
    %253 = arith.subf %1, %252 : vector<32x28xf32>
    %cst_76 = arith.constant 2.800000e+01 : f32
    %254 = vector.broadcast %cst_76 : f32 to vector<32x28xf32>
    %255 = arith.mulf %253, %254 : vector<32x28xf32>
    %256 = vector.broadcast %246 : f32 to vector<32x28xf32>
    %257 = arith.divf %255, %256 : vector<32x28xf32>
    %258 = math.floor %257 : vector<32x28xf32>
    %259 = arith.cmpf oeq, %258, %3 : vector<32x28xf32>
    %260 = arith.andi %251, %259 : vector<32x28xi1>
    %cst_77 = arith.constant 1.000000e+00 : f32
    %cst_78 = arith.constant 0.000000e+00 : f32
    %261 = vector.broadcast %cst_77 : f32 to vector<32x28xf32>
    %262 = vector.broadcast %cst_78 : f32 to vector<32x28xf32>
    %263 = arith.select %260, %261, %262 : vector<32x28xi1>, vector<32x28xf32>
    %264 = vector.broadcast %226 : f32 to vector<28x32xf32>
    %265 = arith.cmpf oge, %7, %264 : vector<28x32xf32>
    %266 = vector.broadcast %234 : f32 to vector<28x32xf32>
    %267 = arith.cmpf olt, %7, %266 : vector<28x32xf32>
    %268 = arith.andi %265, %267 : vector<28x32xi1>
    %269 = vector.broadcast %226 : f32 to vector<28x32xf32>
    %270 = arith.subf %7, %269 : vector<28x32xf32>
    %cst_79 = arith.constant 2.800000e+01 : f32
    %271 = vector.broadcast %cst_79 : f32 to vector<28x32xf32>
    %272 = arith.mulf %270, %271 : vector<28x32xf32>
    %273 = vector.broadcast %242 : f32 to vector<28x32xf32>
    %274 = arith.divf %272, %273 : vector<28x32xf32>
    %275 = math.floor %274 : vector<28x32xf32>
    %276 = arith.cmpf oeq, %275, %5 : vector<28x32xf32>
    %277 = arith.andi %268, %276 : vector<28x32xi1>
    %cst_80 = arith.constant 1.000000e+00 : f32
    %cst_81 = arith.constant 0.000000e+00 : f32
    %278 = vector.broadcast %cst_80 : f32 to vector<28x32xf32>
    %279 = vector.broadcast %cst_81 : f32 to vector<28x32xf32>
    %280 = arith.select %277, %278, %279 : vector<28x32xi1>, vector<28x32xf32>
    %c0_82 = arith.constant 0 : index
    %c3 = arith.constant 3 : index
    %c0_83 = arith.constant 0 : index
    %c0_84 = arith.constant 0 : index
    %281 = vector.load %arg2[%c0_82, %c3, %c0_83, %c0_84] : memref<1x4x28x28xf32, #tpu.memory_space<vmem>>, vector<1x1x28x28xf32>
    %282 = vector.shape_cast %281 : vector<1x1x28x28xf32> to vector<28x28xf32>
    %cst_85 = arith.constant dense<0.000000e+00> : vector<32x28xf32>
    %283 = tpu.matmul %263, %282, %cst_85 {dimension_numbers = #tpu.dot_dimension_numbers<[1], [0], [0], [1], [0, 0, 1, 1], [], []>} : vector<32x28xf32>, vector<28x28xf32>, vector<32x28xf32> -> vector<32x28xf32>
    %cst_86 = arith.constant dense<0.000000e+00> : vector<32x32xf32>
    %284 = tpu.matmul %283, %280, %cst_86 {dimension_numbers = #tpu.dot_dimension_numbers<[1], [0], [0], [1], [0, 0, 1, 1], [], []>} : vector<32x28xf32>, vector<28x32xf32>, vector<32x32xf32> -> vector<32x32xf32>
    %c0_87 = arith.constant 0 : index
    %c3_88 = arith.constant 3 : index
    %c0_89 = arith.constant 0 : index
    %c0_90 = arith.constant 0 : index
    %285 = vector.load %arg3[%c0_87, %c3_88, %c0_89, %c0_90] : memref<1x4x32x32xf32, #tpu.memory_space<vmem>>, vector<1x1x32x32xf32>
    %286 = vector.shape_cast %285 : vector<1x1x32x32xf32> to vector<32x32xf32>
    %287 = vector.shape_cast %284 : vector<32x32xf32> to vector<1x1x32x32xf32>
    tpu.vector_store %arg3[%c0_87, %c3_88, %c0_89, %c0_90], %287 {strides = array<i32>} : memref<1x4x32x32xf32, #tpu.memory_space<vmem>>, vector<1x1x32x32xf32>,
    %cst_91 = arith.constant 1.000000e+00 : f32
    %288 = vector.broadcast %cst_91 : f32 to vector<32x32xf32>
    %289 = arith.subf %288, %284 : vector<32x32xf32>
    %290 = arith.minimumf %219, %289 : vector<32x32xf32>
    %c0_92 = arith.constant 0 : index
    %c0_93 = arith.constant 0 : index
    %c0_94 = arith.constant 0 : index
    %c0_95 = arith.constant 0 : index
    %291 = vector.load %arg4[%c0_92, %c0_93, %c0_94, %c0_95] : memref<1x1x32x32xf32, #tpu.memory_space<vmem>>, vector<1x1x32x32xf32>
    %292 = vector.shape_cast %291 : vector<1x1x32x32xf32> to vector<32x32xf32>
    %293 = vector.shape_cast %290 : vector<32x32xf32> to vector<1x1x32x32xf32>
    tpu.vector_store %arg4[%c0_92, %c0_93, %c0_94, %c0_95], %293 {strides = array<i32>} : memref<1x1x32x32xf32, #tpu.memory_space<vmem>>, vector<1x1x32x32xf32>,
    return
  }
  func.func @transform_0(%arg0: i32, %arg1: memref<48xi32, #tpu.memory_space<smem>>) -> (i32, i32, i32, i32) {
    %c0_i32 = arith.constant 0 : i32
    %c0_i32_0 = arith.constant 0 : i32
    %c0_i32_1 = arith.constant 0 : i32
    %c0_i32_2 = arith.constant 0 : i32
    return %arg0, %c0_i32, %c0_i32_0, %c0_i32_1 : i32, i32, i32, i32
  }
  func.func @transform_1(%arg0: i32, %arg1: memref<48xi32, #tpu.memory_space<smem>>) -> (i32, i32, i32, i32) {
    %c0_i32 = arith.constant 0 : i32
    %c0_i32_0 = arith.constant 0 : i32
    %c0_i32_1 = arith.constant 0 : i32
    %c0_i32_2 = arith.constant 0 : i32
    return %arg0, %c0_i32, %c0_i32_0, %c0_i32_1 : i32, i32, i32, i32
  }
  func.func @transform_2(%arg0: i32, %arg1: memref<48xi32, #tpu.memory_space<smem>>) -> (i32, i32, i32, i32) {
    %c0_i32 = arith.constant 0 : i32
    %c0_i32_0 = arith.constant 0 : i32
    %c0_i32_1 = arith.constant 0 : i32
    %c0_i32_2 = arith.constant 0 : i32
    return %arg0, %c0_i32, %c0_i32_0, %c0_i32_1 : i32, i32, i32, i32
  }
}

</mosaic_0001>

<bundles_post_ra>
// kernel: tpu_custom_call.1
= control target key start
LH: loop header
LB: loop body
LE: loop exit
PB: predicated region body
PF: predicated region fallthrough
CT: control target
= control target key end

     0   :  { %s1451_s15 = smov [#allocation3]   ;;  %s2337_s0 = inlined_call_operand.vmem [shape: s32[48], index: 0, kind: input, shape index: {}]   ;;  %s2338_s1 = inlined_call_operand.vmem [shape: f32[2,4,28,28], index: 1, kind: input, shape index: {}]   ;;  %s2339_s2 = inlined_call_operand.hbm [shape: f32[2,4,32,32], index: 2, kind: output, shape index: {0}]   ;;  %s2340_s3 = inlined_call_operand.hbm [shape: f32[2,1,32,32], index: 3, kind: output, shape index: {1}]  }
   0x1   :  { %s10_s14 = sshll.u32 %s2337_s0, 4  ;;  %s11_s14 = int_to_ptr.vmem [resolvable:$true] %s10_s14 }
   0x2   :  { %13 = dma.vmem_to_smem %s11_s14, 16, %s1451_s15, [#allocation2] }
   0x3   :  { %1425 = dma.done.wait [#allocation2], 16 }
   0x4   :  { %1426 = vsyncadd [#allocation2], 4294967280 }
   0x5   :  { %16 = sfence }
   0x6   :  { %17 = vsyncpa [#allocation5], 0 }
   0x7   :  { %19 = vsyncpa [#allocation5 + $0x1], 0 }
   0x8   :  { %20 = vsyncpa [#allocation7], 0 }
   0x9   :  { %22 = vsyncpa [#allocation7 + $0x1], 0  ;;  %s1479_s16 = smov 0   ;;  %s1481_s17 = smov 0  }
   0xa   :  { %s1483_s18 = smov 0   ;;  %s1485_s19 = smov 0  }
   0xb LB: > { %s1500_s0 = sadd.s32 4294967295, %s1449_s19   ;;  %s1180_s20 = sadd.s32 4294967294, %s1449_s19   ;;  %s1449_s19 = sphi %s1485_s19, %s2424_s19   ;;  %s1445_s18 = sphi %s1483_s18, %s2423_s18   ;;  %s1441_s17 = sphi %s1481_s17, %s2422_s17   ;;  %s1437_s16 = sphi %s1479_s16, %s2421_s16  }
   0xc   : > { %s1504_s21 = sadd.s32 1, %s1449_s19   ;;  %s61_s22 = sadd.s32 1, %s1445_s18 }
   0xd   : > { %s58_s23 = ssub.s32 %s1449_s19, %s1504_s21  ;;  %p71_p0 = scmp.ne.s32.totalorder %s1445_s18, %s1441_s17 }
   0xe   : > { %p59_p1 = scmp.eq.s32.totalorder %s58_s23, 0  ;;  %p72_p2 = scmp.eq.s32.totalorder %s1500_s0, 1 }
   0xf   : > { %p77_p3 = scmp.ne.s32.totalorder %s1441_s17, %s1437_s16  ;;  %p78_p4 = scmp.eq.s32.totalorder %s1180_s20, 1 }
  0x10   : > { %s1515_s24 = scalar_select %p59_p1, %s1445_s18, %s61_s22  }
  0x11   : > { %p1517_p5 = por %p72_p2, %p71_p0  ;;  %p1521_p6 = por %p78_p4, %p77_p3 }
  0x12   : > { %p1183_p7 = scmp.ge.s32.totalorder %s1449_s19, 1  ;;  %p130_p8 = scmp.lt.s32.totalorder %s1449_s19, 3 }
  0x14   : > { %p131_p9 = pnand %p1183_p7, %p130_p8 }
  0x15   : > { %p157_p10 = scmp.lt.s32.totalorder (!%p131_p9), %s1500_s0, 1  ;;  %s1529_s27 = smul.u32 (!%p131_p9), 24, %s1500_s0 }
  0x16   : > { %134 = sbr.rel (%p131_p9) target bundleno = 401 (0x191), region = 24  ;;  %s1533_s30 = sshll.u32 (!%p131_p9), %s1500_s0, 2 }
  0x17   : > { %s177_s7 = sadd.s32 (!%p131_p9), 1, %s1529_s27  ;;  %s189_s8 = sadd.s32 (!%p131_p9), 5, %s1529_s27 }
  0x18   : > { %s190_s9 = sld [smem:[#allocation3 + %s189_s8]] (!%p131_p9)  ;;  %s183_s10 = sadd.s32 (!%p131_p9), 3, %s1529_s27 }
  0x19   : > { %s389_s11 = sadd.s32 (!%p131_p9), 1, %s1533_s30  ;;  %s1552_s12 = sld [smem:[#allocation3 + %s177_s7]] (!%p131_p9) }
  0x1a   : > { %s1554_s13 = smul.u32 (!%p131_p9), 6, %s389_s11  ;;  %s607_s14 = sadd.s32 (!%p131_p9), 2, %s1533_s30 }
  0x1b   : > { %s158_s28 = scalar_select %p157_p10, %s1500_s0, 1  ;;  %vm302_vm0 = vcmask 1043456   ;;  %v162_v7 = vlaneseq  ;;  %vm289_vm9 = vcmask 228352  }
  0x1c   : > { %s393_s15 = sadd.s32 1, %s1554_s13  ;;  %s1560_s20 = sld [smem:[#allocation3 + %s183_s10]] }
  0x1d   : > { %s1273_s29 = sshll.u32 %s158_s28, 7  ;;  %s1562_s23 = smul.u32 6, %s607_s14  ;;  %v163_v9 = vshrl.u32 %v162_v7, 7  ;;  %v172_v17 = vand.u32 127, %v162_v7 }
  0x1e   : > { %s1538_s6 = scalar_lea.vmem %s2338_s1, %s1273_s29  ;;  %s191_s22 = scvt.s32.f32 %s190_s9 }
  0x1f   : > { %v288_v0 = vld [vmem:[%s1538_s6 + $0x18] sm:$0xf]  ;;  %v287_v1 = vld [vmem:[%s1538_s6 + $0x10] sm:$0xff]  ;;  %v286_v4 = vld [vmem:[%s1538_s6 + $0x8] sm:$0xff]  ;;  %s1564_s28 = sld [smem:[#allocation3 + %s393_s15]]  ;;  %s405_s29 = sadd.s32 5, %s1554_s13  ;;  %v1573_v13 = vcvt.s32.f32 %v163_v9  ;;  %v1596_v28 = vcvt.s32.f32 %v172_v17 }
  0x20   : > { %v1205_v2 = vld [vmem:[%s1538_s6 + $0x38] sm:$0xf]  ;;  %1188 = vmatpush.msk.msra.mxu0 %vm302_vm0, %v288_v0  ;;  %v1204_v3 = vld [vmem:[%s1538_s6 + $0x30] sm:$0xff]  ;;  %v1203_v5 = vld [vmem:[%s1538_s6 + $0x28] sm:$0xff]  ;;  %v214_v10 = vstv %s191_s22  ;;  %s406_s4 = sld [smem:[#allocation3 + %s405_s29]]  ;;  %v164_v12 = vadd.s32 8, %v163_v9  ;;  %s179_s5 = scvt.s32.f32 %s1552_s12 }
  0x21   : > { %1206 = vmatpush.msk.msra.mxu2 %vm302_vm0, %v1205_v2  ;;  %v285_v6 = vld [vmem:[%s1538_s6] sm:$0xff]  ;;  %1325 = vrcp.f32 %v214_v10  ;;  %v1247_v11 = vld [vmem:[%s1538_s6 + $0x78] sm:$0xf]  ;;  %s623_s7 = sadd.s32 5, %s1562_s23  ;;  %s399_s9 = sadd.s32 3, %s1554_s13  ;;  %v165_v18 = vadd.s32 16, %v163_v9  ;;  %vm220_vm1 = vweird.f32 %v214_v10 }
  0x22   : > { %319 = vmatpush.msra.mxu0 %v287_v1  ;;  %v1202_v8 = vld [vmem:[%s1538_s6 + $0x20] sm:$0xff]  ;;  %s1571_s8 = sld [smem:[#allocation3 + %s623_s7]]  ;;  %v1576_v14 = vcvt.s32.f32 %v164_v12  ;;  %v1578_v15 = vstv %s179_s5  ;;  %s185_s11 = scvt.s32.f32 %s1560_s20  ;;  %v226_v22 = vand.u32 2147483648, %v214_v10  ;;  %v1246_v24 = vld [vmem:[%s1538_s6 + $0x70] sm:$0xff]  ;;  %v1226_v25 = vld [vmem:[%s1538_s6 + $0x58] sm:$0xf] }
  0x23   : > { %534 = vmatpush.msra.mxu2 %v1204_v3  ;;  %s1582_s14 = sld [smem:[#allocation3 + %s399_s9]]  ;;  %v206_v21 = vsub.f32 %v1573_v13, %v1578_v15  ;;  %v224_v27 = vand.u32 2147483647, %v214_v10  ;;  %s825_s20 = sadd.s32 3, %s1533_s30  ;;  %v1598_v29 = vcvt.s32.f32 %v165_v18  ;;  %v166_v36 = vadd.s32 24, %v163_v9  ;;  %v1245_v49 = vld [vmem:[%s1538_s6 + $0x68] sm:$0xff] }
  0x24   : > { %320 = vmatpush.msra.mxu0 %v286_v4  ;;  %v207_v23 = vsub.f32 %v1576_v14, %v1578_v15  ;;  %v1600_v30 = vstv %s185_s11  ;;  %v227_v35 = vor.u32 1.1754944e-38, %v226_v22  ;;  %s611_s22 = sadd.s32 1, %s1562_s23  ;;  %s1612_s30 = smul.u32 6, %s825_s20  ;;  %vm193_vm5 = vcmp.ge.f32.partialorder %v1573_v13, %v1578_v15  ;;  %v1225_v50 = vld [vmem:[%s1538_s6 + $0x50] sm:$0xff]  ;;  %v1244_v18 = vld [vmem:[%s1538_s6 + $0x60] sm:$0xff] }
  0x25   : > { %535 = vmatpush.msra.mxu2 %v1203_v5  ;;  %s395_s12 = scvt.s32.f32 %s1564_s28  ;;  %v210_v37 = vmul.f32 28.0, %v206_v21  ;;  %vm225_vm4 = vcmp.eq.f32.partialorder %v224_v27, 8.507059e+37  ;;  %vm198_vm6 = vcmp.lt.f32.partialorder %v1573_v13, %v1600_v30  ;;  %v208_v42 = vsub.f32 %v1598_v29, %v1578_v15  ;;  %s1629_s29 = sld [smem:[#allocation3 + %s611_s22]] }
  0x26   : > { %321 = vmatpush.msra.mxu0 %v285_v6  ;;  %s407_s10 = scvt.s32.f32 %s406_s4  ;;  %v211_v39 = vmul.f32 28.0, %v207_v23  ;;  %v1637_v51 = vcvt.s32.f32 %v166_v36  ;;  %s841_s4 = sadd.s32 5, %s1612_s30  ;;  %vm194_vm10 = vcmp.ge.f32.partialorder %v1576_v14, %v1578_v15  ;;  %vm199_vm11 = vcmp.lt.f32.partialorder %v1576_v14, %v1600_v30  ;;  %vm1654_vm12 = vmand %vm193_vm5, %vm198_vm6  ;;  %v1223_v23 = vld [vmem:[%s1538_s6 + $0x40] sm:$0xff] }
  0x27   : > { %536 = vmatpush.msra.mxu2 %v1202_v8  ;;  %v1326_v16 = vpop.eup %1325  ;;  %v1602_v32 = vstv %s395_s12  ;;  %v212_v56 = vmul.f32 28.0, %v208_v42  ;;  %s1660_s5 = sld [smem:[#allocation3 + %s841_s4]]  ;;  %s829_s7 = sadd.s32 1, %s1612_s30  ;;  %v1452_v8 = vmov 0.0   ;;  %vm195_vm6 = vcmp.ge.f32.partialorder %v1598_v29, %v1578_v15 }
  0x28   : > { %v216_v19 = vmul.f32 %v1326_v16, %v214_v10  ;;  %v1584_v20 = vstv %s407_s10  ;;  %s625_s15 = scvt.s32.f32 %s1571_s8  ;;  %vm221_vm2 = vweird.f32 %v1326_v16  ;;  %1227 = vmatpush.msk.msrb.mxu0 %vm302_vm0, %v1226_v25  ;;  %v422_v41 = vsub.f32 %v1573_v13, %v1602_v32  ;;  %s617_s9 = sadd.s32 3, %s1562_s23 }
  0x29   : > { %1248 = vmatpush.msk.msrb.mxu2 %vm302_vm0, %v1247_v11  ;;  %1327 = vrcp.f32 %v1584_v20  ;;  %vm1606_vm3 = vmor %vm220_vm1, %vm221_vm2  ;;  %s401_s28 = scvt.s32.f32 %s1582_s14  ;;  %vm436_vm7 = vweird.f32 %v1584_v20  ;;  %v423_v45 = vsub.f32 %v1576_v14, %v1602_v32  ;;  %v440_v47 = vand.u32 2147483647, %v1584_v20  ;;  %s1722_s10 = sld [smem:[#allocation3 + %s829_s7]] }
  0x2a   : > { %v217_v26 = vsub.f32 1.0, %v216_v19  ;;  %v1604_v33 = vstv %s625_s15  ;;  %v442_v48 = vand.u32 2147483648, %v1584_v20  ;;  %752 = vmatpush.msrb.mxu0 %v1225_v50  ;;  %v426_v62 = vmul.f32 28.0, %v422_v41  ;;  %vm1691_vm2 = vmand %vm194_vm10, %vm199_vm11  ;;  %v1224_v19 = vld [vmem:[%s1538_s6 + $0x48] sm:$0xff]  ;;  %s1758_s11 = sld [smem:[#allocation3 + %s617_s9]]  ;;  %s835_s14 = sadd.s32 3, %s1612_s30 }
  0x2b   : > { %970 = vmatpush.msrb.mxu2 %v1246_v24  ;;  %1329 = vrcp.f32 %v1604_v33  ;;  %v1658_v59 = vstv %s401_s28  ;;  %v427_v1 = vmul.f32 28.0, %v423_v45  ;;  %vm1672_vm15 = vcmp.eq.f32.partialorder %v440_v47, 8.507059e+37  ;;  %s613_s8 = scvt.s32.f32 %s1629_s29  ;;  %s1840_s20 = sld [smem:[#allocation3 + %s835_s14]] }
  0x2c   : > { %v218_v31 = vmul.f32 %v1326_v16, %v217_v26  ;;  %v443_v0 = vor.u32 1.1754944e-38, %v442_v48  ;;  %v209_v5 = vsub.f32 %v1637_v51, %v1578_v15  ;;  %vm414_vm5 = vcmp.lt.f32.partialorder %v1573_v13, %v1658_v59  ;;  %753 = vmatpush.msrb.mxu0 %v1224_v19  ;;  %s186_s22 = sadd.s32 4, %s1529_s27  ;;  %s1946_s4 = sld [smem:[#allocation3 + %s1529_s27]] }
  0x2d   : > { %971 = vmatpush.msrb.mxu2 %v1245_v49  ;;  %vm654_vm10 = vweird.f32 %v1604_v33  ;;  %s843_s6 = scvt.s32.f32 %s1660_s5  ;;  %v658_v41 = vand.u32 2147483647, %v1604_v33  ;;  %s1894_s28 = sld [smem:[#allocation3 + %s186_s22]] }
  0x2e   : > { %v219_v38 = vadd.f32 %v1326_v16, %v218_v31  ;;  %v213_v22 = vmul.f32 28.0, %v209_v5  ;;  %754 = vmatpush.msrb.mxu0 %v1223_v23  ;;  %s180_s7 = sadd.s32 2, %s1529_s27  ;;  %s396_s14 = sadd.s32 2, %s1554_s13 }
  0x2f   : > { %v1328_v40 = vpop.eup %1327  ;;  %972 = vmatpush.msrb.mxu2 %v1244_v18  ;;  %v866_v49 = vstv %s843_s6  ;;  %s831_s12 = scvt.s32.f32 %s1722_s10  ;;  %s402_s10 = sadd.s32 4, %s1554_s13 }
  0x30   : > { %v223_v43 = vsel %vm1606_vm3, %v1326_v16, %v219_v38  ;;  %v432_v44 = vmul.f32 %v1328_v40, %v1584_v20  ;;  %vm437_vm8 = vweird.f32 %v1328_v40  ;;  %v424_v16 = vsub.f32 %v1598_v29, %v1602_v32  ;;  %s619_s15 = scvt.s32.f32 %s1758_s11  ;;  %s403_s6 = sld [smem:[#allocation3 + %s402_s10]] }
  0x31   : > { %v1631_v46 = vsel %vm225_vm4, %v227_v35, %v223_v43  ;;  %v1642_v55 = vpop.eup %1329  ;;  %vm1665_vm13 = vmor %vm436_vm7, %vm437_vm8  ;;  %vm409_vm4 = vcmp.ge.f32.partialorder %v1573_v13, %v1602_v32  ;;  %vm200_vm7 = vcmp.lt.f32.partialorder %v1598_v29, %v1600_v30  ;;  %v1741_v35 = vstv %s613_s8  ;;  %s837_s29 = scvt.s32.f32 %s1840_s20  ;;  %s1995_s8 = sld [smem:[#allocation3 + %s180_s7]] }
  0x32   : > { %v229_v52 = vmul.f32 %v1631_v46, %v210_v37  ;;  %v433_v53 = vsub.f32 1.0, %v432_v44  ;;  %v230_v54 = vmul.f32 %v1631_v46, %v211_v39  ;;  %v650_v2 = vmul.f32 %v1642_v55, %v1604_v33  ;;  %s176_s27 = scvt.s32.f32 %s1946_s4  ;;  %s620_s22 = sadd.s32 4, %s1562_s23 }
  0x33   : > { %v231_v6 = vmul.f32 %v1631_v46, %v212_v56  ;;  %vm655_vm11 = vweird.f32 %v1642_v55  ;;  %v428_v34 = vmul.f32 28.0, %v424_v16  ;;  %v660_v37 = vand.u32 2147483648, %v1604_v33  ;;  %s188_s5 = scvt.s32.f32 %s1894_s28  ;;  %s2127_s28 = sld [smem:[#allocation3 + %s620_s22]] }
  0x34   : > { %v233_v58 = vfloor.f32 %v229_v52  ;;  %v434_v60 = vmul.f32 %v1328_v40, %v433_v53  ;;  %v234_v61 = vfloor.f32 %v230_v54  ;;  %v651_v7 = vsub.f32 1.0, %v650_v2  ;;  %s609_s7 = sld [smem:[#allocation3 + %s1562_s23]] }
  0x35   : > { %v235_v24 = vfloor.f32 %v231_v6  ;;  %v232_v43 = vmul.f32 %v1631_v46, %v213_v22  ;;  %v425_v44 = vsub.f32 %v1637_v51, %v1602_v32  ;;  %v640_v45 = vsub.f32 %v1573_v13, %v1741_v35 }
  0x36   : > { %vm237_vm14 = vcmp.eq.f32.partialorder %v233_v58, %v1596_v28  ;;  %v435_v3 = vadd.f32 %v1328_v40, %v434_v60  ;;  %vm1696_vm3 = vcmp.eq.f32.partialorder %v234_v61, %v1596_v28  ;;  %v652_v25 = vmul.f32 %v1642_v55, %v651_v7  ;;  %s404_s11 = scvt.s32.f32 %s403_s6 }
  0x37   : > { %vm241_vm1 = vmand %vm1654_vm12, %vm237_vm14  ;;  %vm415_vm14 = vcmp.lt.f32.partialorder %v1576_v14, %v1658_v59  ;;  %v661_v50 = vor.u32 1.1754944e-38, %v660_v37  ;;  %1331 = vrcp.f32 %v866_v49  ;;  %v236_v53 = vfloor.f32 %v232_v43  ;;  %s182_s9 = scvt.s32.f32 %s1995_s8  ;;  %s614_s8 = sadd.s32 2, %s1562_s23 }
  0x38   : > { %v245_v9 = vsel %vm241_vm1, 1.0, %v1452_v8  ;;  %v439_v10 = vsel %vm1665_vm13, %v1328_v40, %v435_v3  ;;  %vm242_vm8 = vmand %vm1691_vm2, %vm1696_vm3  ;;  %vm410_vm13 = vcmp.ge.f32.partialorder %v1576_v14, %v1602_v32  ;;  %v653_v39 = vadd.f32 %v1642_v55, %v652_v25  ;;  %s615_s6 = sld [smem:[#allocation3 + %s614_s8]] }
  0x39   : > { %1189 = vmatmul.msk.f32.vlgmr.msra.gmra.mxu0 %vm289_vm9, %v245_v9  ;;  %v1710_v17 = vsel %vm1672_vm15, %v443_v0, %v439_v10  ;;  %vm1737_vm12 = vmand %vm409_vm4, %vm414_vm5  ;;  %v246_v38 = vsel %vm242_vm8, 1.0, %v1452_v8  ;;  %vm659_vm8 = vcmp.eq.f32.partialorder %v658_v41, 8.507059e+37  ;;  %v429_v54 = vmul.f32 28.0, %v425_v44 }
  0x3a   : > { %v445_v20 = vmul.f32 %v1710_v17, %v426_v62  ;;  %v446_v21 = vmul.f32 %v1710_v17, %v427_v1  ;;  %vm1754_vm15 = vmand %vm195_vm6, %vm200_vm7  ;;  %vm1781_vm6 = vcmp.eq.f32.partialorder %v235_v24, %v1596_v28  ;;  %v447_v48 = vmul.f32 %v1710_v17, %v428_v34  ;;  %s610_s10 = scvt.s32.f32 %s609_s7 }
  0x3b   : > { %vm1773_vm4 = vmor %vm654_vm10, %vm655_vm11  ;;  %vm196_vm11 = vcmp.ge.f32.partialorder %v1637_v51, %v1578_v15  ;;  %v644_v57 = vmul.f32 28.0, %v640_v45  ;;  %v448_v63 = vmul.f32 %v1710_v17, %v429_v54  ;;  %v641_v0 = vsub.f32 %v1576_v14, %v1741_v35 }
  0x3c   : > { %v449_v27 = vfloor.f32 %v445_v20  ;;  %v450_v31 = vfloor.f32 %v446_v21  ;;  %vm1797_vm2 = vmand %vm410_vm13, %vm415_vm14  ;;  %v657_v52 = vsel %vm1773_vm4, %v1642_v55, %v653_v39  ;;  %v451_v56 = vfloor.f32 %v447_v48 }
  0x3d   : > { %vm243_vm7 = vmand %vm1754_vm15, %vm1781_vm6  ;;  %vm411_vm13 = vcmp.ge.f32.partialorder %v1598_v29, %v1602_v32  ;;  %vm416_vm14 = vcmp.lt.f32.partialorder %v1598_v29, %v1658_v59  ;;  %v1831_v55 = vsel %vm659_vm8, %v661_v50, %v657_v52  ;;  %v1332_v60 = vpop.eup %1331  ;;  %vm1849_vm4 = vcmp.eq.f32.partialorder %v236_v53, %v1596_v28 }
  0x3e   : > { %vm453_vm1 = vcmp.eq.f32.partialorder %v449_v27, %v1596_v28  ;;  %vm1802_vm3 = vcmp.eq.f32.partialorder %v450_v31, %v1596_v28  ;;  %v247_v15 = vsel %vm243_vm7, 1.0, %v1452_v8  ;;  %vm1856_vm15 = vmand %vm411_vm13, %vm416_vm14  ;;  %v663_v3 = vmul.f32 %v1831_v55, %v644_v57 }
  0x3f   : > { %vm457_vm5 = vmand %vm1737_vm12, %vm453_vm1  ;;  %vm201_vm12 = vcmp.lt.f32.partialorder %v1637_v51, %v1600_v30  ;;  %v1842_v30 = vstv %s831_s12  ;;  %v868_v4 = vmul.f32 %v1332_v60, %v866_v49  ;;  %v1868_v5 = vstv %s619_s15  ;;  %s391_s12 = sld [smem:[#allocation3 + %s1554_s13]]  ;;  %s838_s13 = sadd.s32 4, %s1612_s30 }
  0x40   : > { %v461_v47 = vsel %vm457_vm5, 1.0, %v1452_v8  ;;  %vm458_vm10 = vmand %vm1797_vm2, %vm1802_vm3  ;;  %vm1861_vm5 = vcmp.eq.f32.partialorder %v451_v56, %v1596_v28  ;;  %v858_v6 = vsub.f32 %v1573_v13, %v1842_v30  ;;  %v878_v7 = vand.u32 2147483648, %v866_v49  ;;  %s397_s15 = sld [smem:[#allocation3 + %s396_s14]]  ;;  %s616_s14 = scvt.s32.f32 %s615_s6 }
  0x41   : > { %1207 = vmatmul.msk.f32.vlgmr.msra.gmra.mxu2 %vm289_vm9, %v461_v47  ;;  %1190 = vmatmul.msk.f32.gmra.mxu0 %vm289_vm9, %v246_v38  ;;  %v462_v58 = vsel %vm458_vm10, 1.0, %v1452_v8  ;;  %vm1844_vm1 = vmand %vm196_vm11, %vm201_vm12  ;;  %v869_v9 = vsub.f32 1.0, %v868_v4  ;;  %vm872_vm2 = vweird.f32 %v866_v49  ;;  %vm873_vm3 = vweird.f32 %v1332_v60  ;;  %s839_s4 = sld [smem:[#allocation3 + %s838_s13]]  ;;  %s1274_s13 = sshll.u32 %s1500_s0, 7 }
  0x42   : > { %vm244_vm6 = vmand %vm1844_vm1, %vm1849_vm4  ;;  %v876_v10 = vand.u32 2147483647, %v866_v49  ;;  %v452_v11 = vfloor.f32 %v448_v63  ;;  %v645_v12 = vmul.f32 28.0, %v641_v0  ;;  %vm412_vm8 = vcmp.ge.f32.partialorder %v1637_v51, %v1602_v32  ;;  %s1064_s7 = scalar_lea.hbm %s2339_s2, %s1274_s13  ;;  %s1373_s13 = scalar_lea.hbm %s2339_s2, 256 }
  0x43   : > { %vm459_vm7 = vmand %vm1856_vm15, %vm1861_vm5  ;;  %vm417_vm10 = vcmp.lt.f32.partialorder %v1637_v51, %v1658_v59  ;;  %v667_v16 = vfloor.f32 %v663_v3  ;;  %v870_v17 = vmul.f32 %v1332_v60, %v869_v9  ;;  %v248_v18 = vsel %vm244_vm6, 1.0, %v1452_v8 }
  0x44   : > { %vm627_vm11 = vcmp.ge.f32.partialorder %v1573_v13, %v1741_v35  ;;  %vm632_vm12 = vcmp.lt.f32.partialorder %v1573_v13, %v1868_v5  ;;  %vm1890_vm13 = vmor %vm872_vm2, %vm873_vm3  ;;  %v879_v20 = vor.u32 1.1754944e-38, %v878_v7  ;;  %v463_v21 = vsel %vm459_vm7, 1.0, %v1452_v8 }
  0x45   : > { %v862_v59 = vmul.f32 28.0, %v858_v6  ;;  %v871_v22 = vadd.f32 %v1332_v60, %v870_v17  ;;  %vm877_vm14 = vcmp.eq.f32.partialorder %v876_v10, 8.507059e+37  ;;  %vm1901_vm1 = vmand %vm412_vm8, %vm417_vm10  ;;  %vm1906_vm4 = vcmp.eq.f32.partialorder %v452_v11, %v1596_v28  ;;  %s392_s20 = scvt.s32.f32 %s391_s12 }
  0x46   : > { %v664_v25 = vmul.f32 %v1831_v55, %v645_v12  ;;  %v642_v26 = vsub.f32 %v1598_v29, %v1741_v35  ;;  %vm1913_vm15 = vmand %vm627_vm11, %vm632_vm12  ;;  %vm1918_vm5 = vcmp.eq.f32.partialorder %v667_v16, %v1596_v28  ;;  %v859_v34 = vsub.f32 %v1576_v14, %v1842_v30 }
  0x47   : > { %v875_v31 = vsel %vm1890_vm13, %v1332_v60, %v871_v22  ;;  %vm460_vm6 = vmand %vm1901_vm1, %vm1906_vm4  ;;  %v1934_v37 = vstv %s837_s29  ;;  %vm628_vm3 = vcmp.ge.f32.partialorder %v1576_v14, %v1741_v35  ;;  %vm633_vm7 = vcmp.lt.f32.partialorder %v1576_v14, %v1868_v5  ;;  %s398_s29 = scvt.s32.f32 %s397_s15  ;;  %s2237_s15 = sand.u32 1, %s1441_s17  }
  0x48   : > { %v1928_v36 = vsel %vm877_vm14, %v879_v20, %v875_v31  ;;  %vm675_vm2 = vmand %vm1913_vm15, %vm1918_vm5  ;;  %v668_v39 = vfloor.f32 %v664_v25  ;;  %v646_v40 = vmul.f32 28.0, %v642_v26  ;;  %v863_v42 = vmul.f32 28.0, %v859_v34 }
  0x49   : > { %1208 = vmatmul.msk.f32.gmra.mxu2 %vm289_vm9, %v462_v58  ;;  %1191 = vmatmul.msk.f32.gmra.mxu0 %vm289_vm9, %v247_v15  ;;  %v881_v38 = vmul.f32 %v1928_v36, %v862_v59  ;;  %vm845_vm8 = vcmp.ge.f32.partialorder %v1573_v13, %v1842_v30  ;;  %vm850_vm10 = vcmp.lt.f32.partialorder %v1573_v13, %v1934_v37  ;;  %v464_v43 = vsel %vm460_vm6, 1.0, %v1452_v8  ;;  %vm1955_vm11 = vmand %vm628_vm3, %vm633_vm7 }
  0x4a   : > { %v679_v44 = vsel %vm675_vm2, 1.0, %v1452_v8  ;;  %vm1960_vm12 = vcmp.eq.f32.partialorder %v668_v39, %v1596_v28  ;;  %v665_v33 = vmul.f32 %v1831_v55, %v646_v40  ;;  %v860_v46 = vsub.f32 %v1598_v29, %v1842_v30  ;;  %vm1969_vm13 = vmand %vm845_vm8, %vm850_vm10 }
  0x4b   : > { %v885_v41 = vfloor.f32 %v881_v38  ;;  %v643_v48 = vsub.f32 %v1637_v51, %v1741_v35  ;;  %v882_v52 = vmul.f32 %v1928_v36, %v863_v42  ;;  %v256_v53 = vstv %s188_s5  ;;  %vm676_vm1 = vmand %vm1955_vm11, %vm1960_vm12  ;;  %s622_s5 = scvt.s32.f32 %s2127_s28  ;;  %s1185_s28 = sshll.u32 %s2237_s15, 5 }
  0x4c   : > { %v669_v54 = vfloor.f32 %v665_v33  ;;  %v864_v56 = vmul.f32 28.0, %v860_v46  ;;  %1333 = vrcp.f32 %v256_v53  ;;  %vm629_vm15 = vcmp.ge.f32.partialorder %v1598_v29, %v1741_v35 }
  0x4d   : > { %vm1974_vm14 = vcmp.eq.f32.partialorder %v885_v41, %v1596_v28  ;;  %v647_v57 = vmul.f32 28.0, %v643_v48  ;;  %v886_v58 = vfloor.f32 %v882_v52  ;;  %vm634_vm5 = vcmp.lt.f32.partialorder %v1598_v29, %v1868_v5 }
  0x4e   : > { %vm893_vm4 = vmand %vm1969_vm13, %vm1974_vm14  ;;  %vm846_vm6 = vcmp.ge.f32.partialorder %v1576_v14, %v1842_v30  ;;  %vm851_vm2 = vcmp.lt.f32.partialorder %v1576_v14, %v1934_v37  ;;  %v680_v60 = vsel %vm676_vm1, 1.0, %v1452_v8  ;;  %v861_v61 = vsub.f32 %v1637_v51, %v1842_v30 }
  0x4f   : > { %v897_v15 = vsel %vm893_vm4, 1.0, %v1452_v8  ;;  %vm2005_vm3 = vmand %vm629_vm15, %vm634_vm5  ;;  %vm2010_vm7 = vcmp.eq.f32.partialorder %v669_v54, %v1596_v28  ;;  %v883_v0 = vmul.f32 %v1928_v36, %v864_v56  ;;  %v666_v1 = vmul.f32 %v1831_v55, %v647_v57 }
  0x50   : > { %vm2016_vm8 = vmand %vm846_vm6, %vm851_vm2  ;;  %vm2021_vm10 = vcmp.eq.f32.partialorder %v886_v58, %v1596_v28  ;;  %v249_v4 = vstv %s176_s27  ;;  %vm630_vm12 = vcmp.ge.f32.partialorder %v1637_v51, %v1741_v35  ;;  %vm635_vm13 = vcmp.lt.f32.partialorder %v1637_v51, %v1868_v5  ;;  %s827_s27 = sld [smem:[#allocation3 + %s1612_s30]] }
  0x51   : > { %1209 = vmatmul.msk.f32.gmra.mxu2 %vm289_vm9, %v463_v21  ;;  %1192 = vmatmul.msk.f32.gmra.mxu0 %vm289_vm9, %v248_v18  ;;  %vm677_vm11 = vmand %vm2005_vm3, %vm2010_vm7  ;;  %v865_v55 = vmul.f32 28.0, %v861_v61  ;;  %v887_v9 = vfloor.f32 %v883_v0  ;;  %v670_v10 = vfloor.f32 %v666_v1  ;;  %v254_v11 = vsub.f32 %v1596_v28, %v249_v4 }
  0x52   : > { %v1334_v6 = vpop.eup %1333  ;;  %vm894_vm14 = vmand %vm2016_vm8, %vm2021_vm10  ;;  %v268_v12 = vand.u32 2147483648, %v256_v53  ;;  %vm262_vm1 = vweird.f32 %v256_v53  ;;  %v266_v17 = vand.u32 2147483647, %v256_v53  ;;  %vm847_vm15 = vcmp.ge.f32.partialorder %v1598_v29, %v1842_v30 }
  0x53   : > { %v258_v7 = vmul.f32 %v1334_v6, %v256_v53  ;;  %vm263_vm4 = vweird.f32 %v1334_v6  ;;  %vm852_vm5 = vcmp.lt.f32.partialorder %v1598_v29, %v1934_v37  ;;  %v898_v18 = vsel %vm894_vm14, 1.0, %v1452_v8  ;;  %vm2058_vm6 = vmand %vm630_vm12, %vm635_vm13 }
  0x54   : > { %v681_v19 = vsel %vm677_vm11, 1.0, %v1452_v8  ;;  %vm2063_vm2 = vcmp.eq.f32.partialorder %v887_v9, %v1596_v28  ;;  %vm2068_vm8 = vcmp.eq.f32.partialorder %v670_v10, %v1596_v28  ;;  %v884_v5 = vmul.f32 %v1928_v36, %v865_v55  ;;  %vm264_vm3 = vmor %vm262_vm1, %vm263_vm4 }
  0x55   : > { %v259_v16 = vsub.f32 1.0, %v258_v7  ;;  %v269_v23 = vor.u32 1.1754944e-38, %v268_v12  ;;  %vm2073_vm7 = vmand %vm847_vm15, %vm852_vm5  ;;  %v251_v24 = vstv %s182_s9  ;;  %v255_v25 = vmul.f32 28.0, %v254_v11  ;;  %s840_s9 = scvt.s32.f32 %s839_s4 }
  0x56   : > { %vm267_vm10 = vcmp.eq.f32.partialorder %v266_v17, 8.507059e+37  ;;  %vm678_vm11 = vmand %vm2058_vm6, %vm2068_vm8  ;;  %vm250_vm13 = vcmp.ge.f32.partialorder %v1596_v28, %v249_v4  ;;  %vm252_vm14 = vcmp.lt.f32.partialorder %v1596_v28, %v251_v24  ;;  %v888_v31 = vfloor.f32 %v884_v5  ;;  %s828_s23 = scvt.s32.f32 %s827_s27  ;;  %s1275_s27 = sshll.u32 %s1500_s0, 5 }
  0x57   : > { %v260_v21 = vmul.f32 %v1334_v6, %v259_v16  ;;  %vm895_vm12 = vmand %vm2073_vm7, %vm2063_vm2  ;;  %vm848_vm1 = vcmp.ge.f32.partialorder %v1637_v51, %v1842_v30  ;;  %vm853_vm4 = vcmp.lt.f32.partialorder %v1637_v51, %v1934_v37  ;;  %v682_v38 = vsel %vm678_vm11, 1.0, %v1452_v8 }
  0x58   : > { %v899_v36 = vsel %vm895_vm12, 1.0, %v1452_v8  ;;  %vm2095_vm15 = vmand %vm250_vm13, %vm252_vm14  ;;  %vm892_vm6 = vcmp.eq.f32.partialorder %v888_v31, %v1596_v28  ;;  %v1453_v37 = vmov 1.0   ;;  %v465_v46 = vstv %s392_s20  ;;  %s1184_s20 = sshll.u32 %s2237_s15, 7 }
  0x59   : > { %1210 = vmatmul.msk.f32.gmra.mxu2 %vm289_vm9, %v464_v43  ;;  %1228 = vmatmul.msk.f32.vlgmr.msrb.gmra.mxu0 %vm289_vm9, %v679_v44  ;;  %v261_v26 = vadd.f32 %v1334_v6, %v260_v21  ;;  %vm2099_vm5 = vmand %vm848_vm1, %vm853_vm4  ;;  %v472_v43 = vstv %s404_s11  ;;  %v470_v49 = vsub.f32 %v1596_v28, %v465_v46  ;;  %v467_v57 = vstv %s398_s29  ;;  %s832_s11 = sadd.s32 2, %s1612_s30  ;;  %s2240_s22 = scalar_lea.vmem [#allocation4], %s1184_s20 }
  0x5a   : > { %vm896_vm11 = vmand %vm2099_vm5, %vm892_vm6  ;;  %1335 = vrcp.f32 %v472_v43  ;;  %v484_v48 = vand.u32 2147483648, %v472_v43  ;;  %vm478_vm13 = vweird.f32 %v472_v43  ;;  %v482_v52 = vand.u32 2147483647, %v472_v43  ;;  %s2163_s12 = sld [smem:[#allocation3 + %s832_s11]]  ;;  %s2267_s29 = scalar_lea.vmem [#allocation6], %s1185_s28 }
  0x5b   : > { %v265_v27 = vsel %vm264_vm3, %v1334_v6, %v261_v26  ;;  %v900_v42 = vsel %vm896_vm11, 1.0, %v1452_v8  ;;  %v471_v54 = vmul.f32 28.0, %v470_v49  ;;  %v690_v62 = vstv %s622_s5  ;;  %s1065_s8 = sshll.u32 %s2240_s22, 4  ;;  %s2290_s11 = scalar_lea.hbm %s2340_s3, %s1275_s27  ;;  %s1066_s8 = int_to_ptr.vmem [resolvable:$true] %s1065_s8 }
  0x5c   : > { %v270_v32 = vsel %vm267_vm10, %v269_v23, %v265_v27  ;;  %v485_v53 = vor.u32 1.1754944e-38, %v484_v48  ;;  %vm483_vm5 = vcmp.eq.f32.partialorder %v482_v52, 8.507059e+37  ;;  %1337 = vrcp.f32 %v690_v62  ;;  %s1082_s0 = sshll.u32 %s2267_s29, 4  ;;  %s1083_s0 = int_to_ptr.vmem [resolvable:$true] %s1082_s0 }
  0x5d   : > { %v271_v34 = vmul.f32 %v270_v32, %v255_v25  ;;  %v908_v1 = vstv %s840_s9  ;;  %v683_v2 = vstv %s610_s10  ;;  %v901_v4 = vstv %s828_s23  ;;  %s1067_s9 = sshll.u32 %s1064_s7, 4  ;;  %s1084_s23 = sshll.u32 %s2290_s11, 4  ;;  %s1068_s9 = int_to_ptr.hbm [resolvable:$true] %s1067_s9  ;;  %s1085_s23 = int_to_ptr.hbm [resolvable:$true] %s1084_s23 }
  0x5e   : > { %1339 = vrcp.f32 %v908_v1  ;;  %v688_v6 = vsub.f32 %v1596_v28, %v683_v2  ;;  %v700_v7 = vand.u32 2147483647, %v690_v62  ;;  %v702_v9 = vand.u32 2147483648, %v690_v62 }
  0x5f   : > { %v272_v40 = vfloor.f32 %v271_v34  ;;  %v906_v12 = vsub.f32 %v1596_v28, %v901_v4  ;;  %v920_v17 = vand.u32 2147483648, %v908_v1  ;;  %v685_v20 = vstv %s616_s14  ;;  %s1367_s14 = sshra.s32 %s1068_s9, 4  ;;  %s1368_s14 = int_to_ptr.hbm [resolvable:$true] %s1367_s14 }
  0x60   : > { %v1336_v44 = vpop.eup %1335  ;;  %v689_v21 = vmul.f32 28.0, %v688_v6  ;;  %s834_s30 = scvt.s32.f32 %s2163_s12  ;;  %v918_v5 = vand.u32 2147483647, %v908_v1  ;;  %s1048_s12 = scalar_lea.sflag [#allocation5], %s2237_s15 }
  0x61   : > { %1249 = vmatmul.msk.f32.vlgmr.msrb.gmra.mxu2 %vm289_vm9, %v897_v15  ;;  %1229 = vmatmul.msk.f32.gmra.mxu0 %vm289_vm9, %v680_v60  ;;  %vm276_vm2 = vcmp.eq.f32.partialorder %v272_v40, %v1637_v51  ;;  %vm275_vm8 = vcmp.eq.f32.partialorder %v272_v40, %v1598_v29  ;;  %vm274_vm7 = vcmp.eq.f32.partialorder %v272_v40, %v1576_v14  ;;  %vm479_vm14 = vweird.f32 %v1336_v44  ;;  %p1374_p0 = scmp.lt.s32.totalorder %s1368_s14, %s2339_s2 }
  0x62   : > { %vm280_vm3 = vmand %vm2095_vm15, %vm276_vm2  ;;  %v474_v45 = vmul.f32 %v1336_v44, %v472_v43  ;;  %vm273_vm4 = vcmp.eq.f32.partialorder %v272_v40, %v1573_v13  ;;  %vm466_vm2 = vcmp.ge.f32.partialorder %v1596_v28, %v465_v46  ;;  %v1338_v0 = vpop.eup %1337  ;;  %v921_v25 = vor.u32 1.1754944e-38, %v920_v17 }
  0x63   : > { %v284_v30 = vsel %vm280_vm3, 1.0, %v1452_v8  ;;  %vm279_vm10 = vmand %vm2095_vm15, %vm275_vm8  ;;  %vm468_vm8 = vcmp.lt.f32.partialorder %v1596_v28, %v467_v57  ;;  %v692_v3 = vmul.f32 %v1338_v0, %v690_v62  ;;  %v903_v27 = vstv %s834_s30  ;;  %s1369_s30 = scalar_lea.hbm %s1368_s14, 128 }
  0x64   : > { %1193 = vmatpush.msk.msra.mxu1 %vm302_vm0, %v284_v30  ;;  %vm278_vm12 = vmand %vm2095_vm15, %vm274_vm7  ;;  %v475_v47 = vsub.f32 1.0, %v474_v45  ;;  %v1340_v10 = vpop.eup %1339  ;;  %v907_v32 = vmul.f32 28.0, %v906_v12  ;;  %p1370_p11 = scmp.ne.s32.totalorder %s1368_s14, %s1369_s30  ;;  %p1375_p1 = scmp.lt.s32.totalorder %s1373_s13, %s1369_s30 }
  0x65   : > { %vm480_vm1 = vmor %vm478_vm13, %vm479_vm14  ;;  %v693_v55 = vsub.f32 1.0, %v692_v3  ;;  %v910_v16 = vmul.f32 %v1340_v10, %v908_v1 }
  0x66   : > { %1194 = vmatpush.msk.msra.mxu1 %vm279_vm10, %v1453_v37  ;;  %v476_v33 = vmul.f32 %v1336_v44, %v475_v47  ;;  %vm277_vm6 = vmand %vm2095_vm15, %vm273_vm4  ;;  %vm696_vm4 = vweird.f32 %v690_v62  ;;  %p1371_p12 = pnand %p1370_p11, %p1517_p5  ;;  %p1376_p2 = por %p1375_p1, %p1374_p0 }
  0x67   : > { %vm2138_vm3 = vmand %vm466_vm2, %vm468_vm8  ;;  %v694_v11 = vmul.f32 %v1338_v0, %v693_v55  ;;  %vm701_vm2 = vcmp.eq.f32.partialorder %v700_v7, 8.507059e+37  ;;  %v911_v22 = vsub.f32 1.0, %v910_v16  ;;  %vm914_vm8 = vweird.f32 %v908_v1 }
  0x68   : > { %1195 = vmatpush.msk.msra.mxu1 %vm278_vm12, %v1453_v37  ;;  %v477_v50 = vadd.f32 %v1336_v44, %v476_v33  ;;  %p1372_p13 = pneg %p1371_p12 }
  0x69   : > { %1250 = vmatmul.msk.f32.gmra.mxu2 %vm289_vm9, %v898_v18  ;;  %1230 = vmatmul.msk.f32.gmra.mxu0 %vm289_vm9, %v681_v19  ;;  %v703_v19 = vor.u32 1.1754944e-38, %v702_v9  ;;  %v695_v59 = vadd.f32 %v1338_v0, %v694_v11  ;;  %v912_v35 = vmul.f32 %v1340_v10, %v911_v22 }
  0x6a   : > { %v481_v56 = vsel %vm480_vm1, %v1336_v44, %v477_v50  ;;  %1196 = vmatpush.msk.msra.mxu1 %vm277_vm6, %v1453_v37  ;;  %p1377_p3 = pnand %p1376_p2, %p1372_p13 }
  0x6b   : > { %v486_v58 = vsel %vm483_vm5, %v485_v53, %v481_v56  ;;  %vm697_vm5 = vweird.f32 %v1338_v0  ;;  %v913_v31 = vadd.f32 %v1340_v10, %v912_v35 }
  0x6c   : > { %v487_v15 = vmul.f32 %v486_v58, %v471_v54  ;;  %vm2167_vm6 = vmor %vm696_vm4, %vm697_vm5 }
  0x6d   : > { %v699_v23 = vsel %vm2167_vm6, %v1338_v0, %v695_v59 }
  0x6e   : > { %v488_v61 = vfloor.f32 %v487_v15  ;;  %v704_v24 = vsel %vm701_vm2, %v703_v19, %v699_v23 }
  0x6f   : > { %v705_v26 = vmul.f32 %v704_v24, %v689_v21 }
  0x70   : > { %vm492_vm15 = vcmp.eq.f32.partialorder %v488_v61, %v1637_v51  ;;  %vm491_vm7 = vcmp.eq.f32.partialorder %v488_v61, %v1598_v29  ;;  %vm490_vm11 = vcmp.eq.f32.partialorder %v488_v61, %v1576_v14  ;;  %vm489_vm14 = vcmp.eq.f32.partialorder %v488_v61, %v1573_v13 }
  0x71   : > { %1251 = vmatmul.msk.f32.gmra.mxu2 %vm289_vm9, %v899_v36  ;;  %1231 = vmatmul.msk.f32.gmra.mxu0 %vm289_vm9, %v682_v38  ;;  %vm496_vm10 = vmand %vm2138_vm3, %vm492_vm15  ;;  %vm684_vm15 = vcmp.ge.f32.partialorder %v1596_v28, %v683_v2  ;;  %v706_v36 = vfloor.f32 %v705_v26 }
  0x72   : > { %v500_v63 = vsel %vm496_vm10, 1.0, %v1452_v8  ;;  %vm495_vm12 = vmand %vm2138_vm3, %vm491_vm7  ;;  %vm686_vm7 = vcmp.lt.f32.partialorder %v1596_v28, %v685_v20 }
  0x73   : > { %1211 = vmatpush.msk.msra.mxu3 %vm302_vm0, %v500_v63  ;;  %vm494_vm13 = vmand %vm2138_vm3, %vm490_vm11  ;;  %vm919_vm11 = vcmp.eq.f32.partialorder %v918_v5, 8.507059e+37  ;;  %vm709_vm4 = vcmp.eq.f32.partialorder %v706_v36, %v1598_v29  ;;  %vm708_vm6 = vcmp.eq.f32.partialorder %v706_v36, %v1576_v14 }
  0x74   : > { %vm493_vm1 = vmand %vm2138_vm3, %vm489_vm14  ;;  %vm915_vm3 = vweird.f32 %v1340_v10  ;;  %vm904_vm14 = vcmp.lt.f32.partialorder %v1596_v28, %v903_v27 }
  0x75   : > { %1212 = vmatpush.msk.msra.mxu3 %vm495_vm12, %v1453_v37  ;;  %vm916_vm10 = vmor %vm914_vm8, %vm915_vm3 }
  0x76   : > { %vm2176_vm12 = vmand %vm684_vm15, %vm686_vm7  ;;  %v917_v38 = vsel %vm916_vm10, %v1340_v10, %v913_v31  ;;  %vm707_vm15 = vcmp.eq.f32.partialorder %v706_v36, %v1573_v13 }
  0x77   : > { %1213 = vmatpush.msk.msra.mxu3 %vm494_vm13, %v1453_v37  ;;  %vm902_vm13 = vcmp.ge.f32.partialorder %v1596_v28, %v901_v4  ;;  %v922_v40 = vsel %vm919_vm11, %v921_v25, %v917_v38  ;;  %vm713_vm2 = vmand %vm2176_vm12, %vm709_vm4 }
  0x78   : > { %v923_v41 = vmul.f32 %v922_v40, %v907_v32  ;;  %vm2191_vm8 = vmand %vm902_vm13, %vm904_vm14 }
  0x79   : > { %1252 = vmatmul.msk.f32.gmra.mxu2 %vm289_vm9, %v900_v42  ;;  %1214 = vmatpush.msk.msra.mxu3 %vm493_vm1, %v1453_v37  ;;  %vm710_vm1 = vcmp.eq.f32.partialorder %v706_v36, %v1637_v51  ;;  %vm712_vm3 = vmand %vm2176_vm12, %vm708_vm6 }
  0x7a   : > { %vm714_vm5 = vmand %vm2176_vm12, %vm710_vm1  ;;  %v924_v42 = vfloor.f32 %v923_v41 }
  0x7b   : > { %v718_v30 = vsel %vm714_vm5, 1.0, %v1452_v8  ;;  %vm711_vm11 = vmand %vm2176_vm12, %vm707_vm15 }
  0x7c   : > { %1232 = vmatpush.msk.msrb.mxu1 %vm302_vm0, %v718_v30  ;;  %vm928_vm7 = vcmp.eq.f32.partialorder %v924_v42, %v1637_v51  ;;  %vm927_vm10 = vcmp.eq.f32.partialorder %v924_v42, %v1598_v29  ;;  %vm926_vm14 = vcmp.eq.f32.partialorder %v924_v42, %v1576_v14  ;;  %vm925_vm4 = vcmp.eq.f32.partialorder %v924_v42, %v1573_v13 }
  0x7d   : > { %vm932_vm13 = vmand %vm2191_vm8, %vm928_vm7 }
  0x7e   : > { %1233 = vmatpush.msk.msrb.mxu1 %vm713_vm2, %v1453_v37  ;;  %v936_v43 = vsel %vm932_vm13, 1.0, %v1452_v8  ;;  %vm931_vm1 = vmand %vm2191_vm8, %vm927_vm10 }
  0x7f   : > { %1253 = vmatpush.msk.msrb.mxu3 %vm302_vm0, %v936_v43  ;;  %vm930_vm12 = vmand %vm2191_vm8, %vm926_vm14  ;;  %vm379_vm0 = vcmask 261120  }
  0x80   : > { %1234 = vmatpush.msk.msrb.mxu1 %vm712_vm3, %v1453_v37  ;;  %vm929_vm5 = vmand %vm2191_vm8, %vm925_vm4 }
  0x81   : > { %1254 = vmatpush.msk.msrb.mxu3 %vm931_vm1, %v1453_v37 }
  0x82   : > { %1235 = vmatpush.msk.msrb.mxu1 %vm711_vm11, %v1453_v37 }
  0x83   : > { %1255 = vmatpush.msk.msrb.mxu3 %vm930_vm12, %v1453_v37 }
  0x85   : > { %1256 = vmatpush.msk.msrb.mxu3 %vm929_vm5, %v1453_v37 }
  0xb6   : > { %v323_v39 = vpop.f32.mrf.mxu0 }
  0xb7   : > { %1197 = vmatmul.msk.f32.vlgmr.msra.gmra.mxu1 %vm289_vm9, %v323_v39 }
  0xbe   : > { %v326_v51 = vpop.f32.mrf.mxu0 }
  0xbf   : > { %1198 = vmatmul.msk.f32.gmra.mxu1 %vm289_vm9, %v326_v51 }
  0xc4   : > { %v538_v14 = vpop.f32.mrf.mxu2 }
  0xc5   : > { %1215 = vmatmul.msk.f32.vlgmr.msra.gmra.mxu3 %vm289_vm9, %v538_v14 }
  0xc6   : > { %v329_v13 = vpop.f32.mrf.mxu0 }
  0xc7   : > { %1199 = vmatmul.msk.f32.gmra.mxu1 %vm289_vm9, %v329_v13 }
  0xcc   : > { %v541_v29 = vpop.f32.mrf.mxu2 }
  0xcd   : > { %1216 = vmatmul.msk.f32.gmra.mxu3 %vm289_vm9, %v541_v29 }
  0xce   : > { %v332_v8 = vpop.f32.mrf.mxu0 }
  0xcf   : > { %1200 = vmatmul.msk.f32.gmra.mxu1 %vm289_vm9, %v332_v8 }
  0xd4   : > { %v544_v44 = vpop.f32.mrf.mxu2 }
  0xd5   : > { %1217 = vmatmul.msk.f32.gmra.mxu3 %vm289_vm9, %v544_v44 }
  0xd6   : > { %v756_v45 = vpop.f32.mrf.mxu0 }
  0xd7   : > { %1236 = vmatmul.msk.f32.vlgmr.msrb.gmra.mxu1 %vm289_vm9, %v756_v45 }
  0xdc   : > { %v547_v47 = vpop.f32.mrf.mxu2 }
  0xdd   : > { %1218 = vmatmul.msk.f32.gmra.mxu3 %vm289_vm9, %v547_v47 }
  0xde   : > { %v759_v37 = vpop.f32.mrf.mxu0 }
  0xdf   : > { %1237 = vmatmul.msk.f32.gmra.mxu1 %vm289_vm9, %v759_v37 }
  0xe4   : > { %v974_v33 = vpop.f32.mrf.mxu2 }
  0xe5   : > { %1257 = vmatmul.msk.f32.vlgmr.msrb.gmra.mxu3 %vm289_vm9, %v974_v33 }
  0xe6   : > { %v762_v46 = vpop.f32.mrf.mxu0 }
  0xe7   : > { %1238 = vmatmul.msk.f32.gmra.mxu1 %vm289_vm9, %v762_v46 }
  0xec   : > { %v977_v48 = vpop.f32.mrf.mxu2 }
  0xed   : > { %1258 = vmatmul.msk.f32.gmra.mxu3 %vm289_vm9, %v977_v48 }
  0xee   : > { %v765_v49 = vpop.f32.mrf.mxu0 }
  0xef   : > { %1239 = vmatmul.msk.f32.gmra.mxu1 %vm289_vm9, %v765_v49 }
  0xf4   : > { %v980_v50 = vpop.f32.mrf.mxu2 }
  0xf5   : > { %1259 = vmatmul.msk.f32.gmra.mxu3 %vm289_vm9, %v980_v50 }
  0xfc   : > { %v983_v52 = vpop.f32.mrf.mxu2 }
  0xfd   : > { %1260 = vmatmul.msk.f32.gmra.mxu3 %vm289_vm9, %v983_v52 }
 0x134   : > { %v367_v53 = vpop.f32.mrf.mxu1 }
 0x135   : > { %380 = vst.msk [vmem:[%s2240_s22] sm:$0xff] %vm379_vm0, %v367_v53  ;;  %v384_v2 = vsub.f32 1.0, %v367_v53 }
 0x13c   : > { %v370_v54 = vpop.f32.mrf.mxu1 }
 0x13d   : > { %381 = vst.msk [vmem:[%s2240_s22 + $0x8] sm:$0xff] %vm379_vm0, %v370_v54  ;;  %v385_v11 = vsub.f32 1.0, %v370_v54 }
 0x144   : > { %v373_v56 = vpop.f32.mrf.mxu1 }
 0x145   : > { %382 = vst.msk [vmem:[%s2240_s22 + $0x10] sm:$0xff] %vm379_vm0, %v373_v56  ;;  %v386_v22 = vsub.f32 1.0, %v373_v56 }
 0x148   : > { %v582_v57 = vpop.f32.mrf.mxu3 }
 0x149   : > { %1219 = vst.msk [vmem:[%s2240_s22 + $0x20] sm:$0xff] %vm379_vm0, %v582_v57  ;;  %v599_v0 = vsub.f32 1.0, %v582_v57 }
 0x14b   : > { %v603_v4 = vmin.f32 %v384_v2, %v599_v0 }
 0x14c   : > { %v376_v58 = vpop.f32.mrf.mxu1 }
 0x14d   : > { %383 = vst.msk [vmem:[%s2240_s22 + $0x18] sm:$0xff] %vm379_vm0, %v376_v58  ;;  %v387_v32 = vsub.f32 1.0, %v376_v58 }
 0x150   : > { %v585_v15 = vpop.f32.mrf.mxu3 }
 0x151   : > { %1220 = vst.msk [vmem:[%s2240_s22 + $0x28] sm:$0xff] %vm379_vm0, %v585_v15  ;;  %v600_v9 = vsub.f32 1.0, %v585_v15 }
 0x153   : > { %v604_v17 = vmin.f32 %v385_v11, %v600_v9 }
 0x154   : > { %v800_v60 = vpop.f32.mrf.mxu1 }
 0x155   : > { %1240 = vst.msk [vmem:[%s2240_s22 + $0x40] sm:$0xff] %vm379_vm0, %v800_v60  ;;  %v817_v3 = vsub.f32 1.0, %v800_v60 }
 0x157   : > { %v821_v55 = vmin.f32 %v603_v4, %v817_v3 }
 0x158   : > { %v588_v61 = vpop.f32.mrf.mxu3 }
 0x159   : > { %1221 = vst.msk [vmem:[%s2240_s22 + $0x30] sm:$0xff] %vm379_vm0, %v588_v61  ;;  %v601_v21 = vsub.f32 1.0, %v588_v61 }
 0x15b   : > { %v605_v23 = vmin.f32 %v386_v22, %v601_v21 }
 0x15c   : > { %v803_v62 = vpop.f32.mrf.mxu1 }
 0x15d   : > { %1241 = vst.msk [vmem:[%s2240_s22 + $0x48] sm:$0xff] %vm379_vm0, %v803_v62  ;;  %v818_v12 = vsub.f32 1.0, %v803_v62 }
 0x15f   : > { %v822_v19 = vmin.f32 %v604_v17, %v818_v12 }
 0x160   : > { %v591_v63 = vpop.f32.mrf.mxu3 }
 0x161   : > { %1222 = vst.msk [vmem:[%s2240_s22 + $0x38] sm:$0xff] %vm379_vm0, %v591_v63  ;;  %v602_v26 = vsub.f32 1.0, %v591_v63 }
 0x163   : > { %v606_v34 = vmin.f32 %v387_v32, %v602_v26 }
 0x164   : > { %v806_v1 = vpop.f32.mrf.mxu1 }
 0x165   : > { %1242 = vst.msk [vmem:[%s2240_s22 + $0x50] sm:$0xff] %vm379_vm0, %v806_v1  ;;  %v819_v5 = vsub.f32 1.0, %v806_v1 }
 0x167   : > { %v823_v24 = vmin.f32 %v605_v23, %v819_v5 }
 0x168   : > { %v1018_v6 = vpop.f32.mrf.mxu3 }
 0x169   : > { %1261 = vst.msk [vmem:[%s2240_s22 + $0x60] sm:$0xff] %vm379_vm0, %v1018_v6  ;;  %v1035_v7 = vsub.f32 1.0, %v1018_v6 }
 0x16b   : > { %v1039_v10 = vmin.f32 %v821_v55, %v1035_v7 }
 0x16c   : > { %v809_v16 = vpop.f32.mrf.mxu1 }
 0x16d   : > { %1043 = vst.msk [vmem:[%s2267_s29] sm:$0xff] %vm379_vm0, %v1039_v10  ;;  %v820_v31 = vsub.f32 1.0, %v809_v16 }
 0x16e   : > { %1243 = vst.msk [vmem:[%s2240_s22 + $0x58] sm:$0xff] %vm379_vm0, %v809_v16 }
 0x16f   : > { %v824_v38 = vmin.f32 %v606_v34, %v820_v31 }
 0x170   : > { %v1021_v18 = vpop.f32.mrf.mxu3 }
 0x171   : > { %1262 = vst.msk [vmem:[%s2240_s22 + $0x68] sm:$0xff] %vm379_vm0, %v1021_v18  ;;  %v1036_v20 = vsub.f32 1.0, %v1021_v18 }
 0x173   : > { %v1040_v59 = vmin.f32 %v822_v19, %v1036_v20 }
 0x175   : > { %1044 = vst.msk [vmem:[%s2267_s29 + $0x8] sm:$0xff] %vm379_vm0, %v1040_v59 }
 0x178   : > { %v1024_v35 = vpop.f32.mrf.mxu3 }
 0x179   : > { %1263 = vst.msk [vmem:[%s2240_s22 + $0x70] sm:$0xff] %vm379_vm0, %v1024_v35  ;;  %v1037_v25 = vsub.f32 1.0, %v1024_v35 }
 0x17b   : > { %v1041_v27 = vmin.f32 %v823_v24, %v1037_v25 }
 0x17d   : > { %1045 = vst.msk [vmem:[%s2267_s29 + $0x10] sm:$0xff] %vm379_vm0, %v1041_v27 }
 0x180   : > { %v1027_v36 = vpop.f32.mrf.mxu3 }
 0x181   : > { %1264 = vst.msk [vmem:[%s2240_s22 + $0x78] sm:$0xff] %vm379_vm0, %v1027_v36  ;;  %v1038_v39 = vsub.f32 1.0, %v1027_v36 }
 0x182   : > { %1380 = shalt.err (!%p1377_p3)
}
 0x183   : > { %s1454_s22 = smov 128   ;;  %s1455_s7 = smov 8   ;;  %v1042_v40 = vmin.f32 %v824_v38, %v1038_v39 }
 0x184   : > { %1276 = dma.vmem_to_hbm [thread:$0]  (%p1517_p5), %s1066_s8, 2048, %s1068_s9, %s1048_s12, %s1454_s22, %s1454_s22, %s1455_s7  }
 0x185   : > { %1046 = vst.msk [vmem:[%s2267_s29 + $0x18] sm:$0xff] %vm379_vm0, %v1042_v40  ;;  %s1053_s27 = scalar_lea.sflag [#allocation7], %s2237_s15  ;;  %s1395_s10 = sshra.s32 %s1085_s23, 4  ;;  %s1396_s10 = int_to_ptr.hbm [resolvable:$true] %s1395_s10 }
 0x186   : > { %s1397_s6 = scalar_lea.hbm %s1396_s10, 32  ;;  %s1401_s30 = scalar_lea.hbm %s2340_s3, 64 }
 0x187   : > { %p1398_p4 = scmp.ne.s32.totalorder %s1396_s10, %s1397_s6  ;;  %p1402_p9 = scmp.lt.s32.totalorder %s1396_s10, %s2340_s3 }
 0x188   : > { %p1403_p10 = scmp.lt.s32.totalorder %s1401_s30, %s1397_s6 }
 0x189   : > { %p1399_p7 = pnand %p1398_p4, %p1517_p5 }
 0x18a   : > { %p1404_p11 = por %p1403_p10, %p1402_p9 }
 0x18b   : > { %p1400_p8 = pneg %p1399_p7 }
 0x18d   : > { %p1405_p12 = pnand %p1404_p11, %p1400_p8 }
 0x18f   : > { %1408 = shalt.err (!%p1405_p12)
}
 0x190   : > { %1277 = dma.vmem_to_hbm [thread:$0]  (%p1517_p5), %s1083_s0, 512, %s1085_s23, %s1053_s27, %s1454_s22, %s1454_s22, %s1455_s7  }
 0x191 PF: > { %p1287_p13 = scmp.ge.s32.totalorder %s1449_s19, 2  ;;  %s1099_s15 = sand.u32 1, %s1437_s16  }
 0x192   : > { %s1100_s29 = scalar_lea.sflag [#allocation5], %s1099_s15 }
 0x193   : > { %p1281_p0 = pnand %p1287_p13, %p1521_p6 }
 0x195   : > { %p1282_p1 = pneg %p1281_p0 }
 0x197   : > { %1428 = dma.done.wait (%p1282_p1), %s1100_s29, 2048  }
 0x198   : > { %1430 = vsyncadd (%p1282_p1), %s1100_s29, 4294965248  ;;  %s1110_s8 = scalar_lea.sflag [#allocation7], %s1099_s15 }
 0x199   : > { %1432 = dma.done.wait (%p1282_p1), %s1110_s8, 512  }
 0x19a   : > { %1434 = vsyncadd (%p1282_p1), %s1110_s8, 4294966784  ;;  %p25_p5 = scmp.ge.s32.totalorder %s1504_s21, 4   ;;  %s2421_s16 = smov %s1441_s17 }
 0x19b   : > { %s2422_s17 = smov %s1445_s18  ;;  %s2423_s18 = smov %s1515_s24 }
 0x19c   : > { %s2424_s19 = smov %s1504_s21  ;;  %27 = sbr.rel (!%p25_p5) target bundleno = 11 (0xb), region = 82 }
 0x1a1   :  { %1116 = vsyncpa [#allocation5], 1 }
 0x1a2   :  { %1118 = vsyncpa [#allocation5 + $0x1], 1 }
 0x1a3   :  { %1119 = vsyncpa [#allocation7], 1 }
 0x1a4   :  { %1121 = vsyncpa [#allocation7 + $0x1], 1 }

</bundles_post_ra>
